<compile_context>
chip_gen: v7x
topology: tpu7x:2x2x1
jax: 0.10.0
libtpu: 0.0.40
codegen_flags: <defaults>
</compile_context>

<pallas_src>
import jax
import jax.numpy as jnp
from jax.experimental import pallas as pl
from jax.experimental.pallas import tpu as pltpu


def _gab_kernel(xp_ref, w_ref, b_ref, res_ref, o_ref):
    # xp_ref : (1, H+2, W+2, Cin)  bf16   zero-padded interleaved activations
    # w_ref  : (9, Cin, Cout)      bf16   conv weight, tap-major (kh*3+kw)
    # b_ref  : (1, Cout)           f32    conv bias
    # res_ref: (1, H, W, Cout)     f32    residual (the original x, NHWC)
    # o_ref  : (1, H, W, Cout)     f32
    _, H, W, Cout = o_ref.shape
    Cin = xp_ref.shape[3]

    x0 = xp_ref[0]                                   # (H+2, W+2, Cin) bf16
    acc = jnp.zeros((H * W, Cout), jnp.float32)
    for kh in range(3):                              # unrolled: 9 MXU matmuls
        for kw in range(3):
            patch = x0[kh:kh + H, kw:kw + W, :].reshape(H * W, Cin)
            acc = acc + jnp.dot(patch, w_ref[kh * 3 + kw],
                                preferred_element_type=jnp.float32)

    out = jnp.maximum(acc + b_ref[...], 0.0)         # bias + ReLU
    out = out + res_ref[...].reshape(H * W, Cout)    # residual add (x + conv(...))
    o_ref[...] = out.reshape(1, H, W, Cout).astype(o_ref.dtype)


def gab_forward(x, y, weight, bias):
    """GAB forward. x: (N, C, H, W), y: (N, 1, H, W), weight: (C, C+G, 3, 3)."""
    N, C, H, W = x.shape
    Cout, Cin, KH, KW = weight.shape
    group = Cin - C                                  # forward hard-codes 32 chunks
    assert Cout == C and KH == 3 and KW == 3 and C % group == 0

    # ---- glue (pure data movement, XLA): interleave chunks of x with y ----
    xg = x.reshape(N, group, C // group, H, W)
    yb = jnp.broadcast_to(y[:, None], (N, group, 1, H, W))
    x_cat = jnp.concatenate([xg, yb], axis=2).reshape(N, Cin, H, W)

    # NHWC + spatial zero-pad, bf16 for the MXU stream.
    xc = jnp.transpose(x_cat, (0, 2, 3, 1))                       # (N, H, W, Cin)
    xp = jnp.pad(xc, ((0, 0), (1, 1), (1, 1), (0, 0))).astype(jnp.bfloat16)

    # Weight (Cout, Cin, 3, 3) -> (9, Cin, Cout), tap-major, bf16.
    w_taps = jnp.transpose(weight, (2, 3, 1, 0)).reshape(9, Cin, Cout)
    w_taps = w_taps.astype(jnp.bfloat16)
    b2 = bias.reshape(1, Cout).astype(jnp.float32)
    res = jnp.transpose(x, (0, 2, 3, 1)).astype(jnp.float32)      # (N, H, W, C)

    out_nhwc = pl.pallas_call(
        _gab_kernel,
        out_shape=jax.ShapeDtypeStruct((N, H, W, Cout), jnp.float32),
        grid_spec=pltpu.PrefetchScalarGridSpec(
            num_scalar_prefetch=0,
            grid=(N,),                                            # one image per step
            in_specs=[
                pl.BlockSpec((1, H + 2, W + 2, Cin), lambda n: (n, 0, 0, 0)),
                pl.BlockSpec((9, Cin, Cout), lambda n: (0, 0, 0)),
                pl.BlockSpec((1, Cout), lambda n: (0, 0)),
                pl.BlockSpec((1, H, W, Cout), lambda n: (n, 0, 0, 0)),
            ],
            out_specs=pl.BlockSpec((1, H, W, Cout), lambda n: (n, 0, 0, 0)),
        ),
        compiler_params=pltpu.CompilerParams(
            dimension_semantics=("parallel",)),
    )(xp, w_taps, b2, res)

    return jnp.transpose(out_nhwc, (0, 3, 1, 2))                  # back to NCHW


if __name__ == "__main__":
    # GAB(channel=32, subchannel=1) -> group = 32 (the forward hard-codes 32 chunks).
    channel, subchannel = 32, 1
    group = channel // subchannel
    N, H, W = 2, 16, 16
    Cin = channel + group

    key = jax.random.PRNGKey(0)
    kx, ky, kw, kb = jax.random.split(key, 4)
    x = jax.random.normal(kx, (N, channel, H, W), dtype=jnp.float32)
    y = jax.random.normal(ky, (N, 1, H, W), dtype=jnp.float32)
    weight = jax.random.normal(kw, (channel, Cin, 3, 3), dtype=jnp.float32) * 0.05
    bias = jax.random.normal(kb, (channel,), dtype=jnp.float32) * 0.05

    fn = jax.jit(gab_forward)
    out = jax.block_until_ready(fn(x, y, weight, bias))

    # ---- pure-JAX reference (exact module semantics, f32) ----
    xg = x.reshape(N, group, channel // group, H, W)
    yb = jnp.broadcast_to(y[:, None], (N, group, 1, H, W))
    x_cat = jnp.concatenate([xg, yb], axis=2).reshape(N, Cin, H, W)
    conv = jax.lax.conv_general_dilated(
        x_cat, weight, window_strides=(1, 1),
        padding=[(1, 1), (1, 1)],
        dimension_numbers=("NCHW", "OIHW", "NCHW")) + bias[None, :, None, None]
    ref = x + jnp.maximum(conv, 0.0)

    assert out.shape == (N, channel, H, W)
    err = float(jnp.max(jnp.abs(out - ref)))
    # bf16 MXU operands with f32 accumulation: loosened tolerance vs exact f32.
    assert err < 5e-2, f"max abs err {err}"
    print("KERNEL_OK")
</pallas_src>

<mosaic_0001>
module attributes {stable_mosaic.version = 11 : i64} {
  func.func @_gab_kernel(%arg0: i32, %arg1: memref<1x18x18x64xbf16, #tpu.memory_space<vmem>>, %arg2: memref<9x64x32xbf16, #tpu.memory_space<vmem>>, %arg3: memref<1x32xf32, #tpu.memory_space<vmem>>, %arg4: memref<1x16x16x32xf32, #tpu.memory_space<vmem>>, %arg5: memref<1x16x16x32xf32, #tpu.memory_space<vmem>>) attributes {dimension_semantics = [#tpu.dimension_semantics<parallel>], iteration_bounds = array<i64: 2>, scalar_prefetch = 0 : i64, scratch_operands = 0 : i64, tpu.core_type = #tpu.core_type<tc>, window_params = [{transform_indices = @transform_0, window_bounds = array<i64: 1, 18, 18, 64>}, {pipeline_mode = #tpu.pipeline_mode<synchronous>, transform_indices = @transform_1, window_bounds = array<i64: 9, 64, 32>}, {pipeline_mode = #tpu.pipeline_mode<synchronous>, transform_indices = @transform_2, window_bounds = array<i64: 1, 32>}, {transform_indices = @transform_3, window_bounds = array<i64: 1, 16, 16, 32>}, {transform_indices = @transform_4, window_bounds = array<i64: 1, 16, 16, 32>}]} {
    %c0 = arith.constant 0 : index
    %c0_0 = arith.constant 0 : index
    %c0_1 = arith.constant 0 : index
    %c0_2 = arith.constant 0 : index
    %0 = vector.load %arg1[%c0, %c0_0, %c0_1, %c0_2] : memref<1x18x18x64xbf16, #tpu.memory_space<vmem>>, vector<1x18x18x64xbf16>
    %1 = vector.shape_cast %0 : vector<1x18x18x64xbf16> to vector<18x18x64xbf16>
    %cst = arith.constant 0.000000e+00 : f32
    %2 = vector.broadcast %cst : f32 to vector<256x32xf32>
    %3 = vector.extract_strided_slice %1 {offsets = [0, 0, 0], sizes = [16, 16, 64], strides = [1, 1, 1]} : vector<18x18x64xbf16> to vector<16x16x64xbf16>
    %4 = vector.shape_cast %3 : vector<16x16x64xbf16> to vector<256x64xbf16>
    %c0_3 = arith.constant 0 : index
    %c0_4 = arith.constant 0 : index
    %c0_5 = arith.constant 0 : index
    %5 = vector.load %arg2[%c0_3, %c0_4, %c0_5] : memref<9x64x32xbf16, #tpu.memory_space<vmem>>, vector<1x64x32xbf16>
    %6 = vector.shape_cast %5 : vector<1x64x32xbf16> to vector<64x32xbf16>
    %cst_6 = arith.constant dense<0.000000e+00> : vector<256x32xf32>
    %7 = tpu.matmul %4, %6, %cst_6 {dimension_numbers = #tpu.dot_dimension_numbers<[1], [0], [0], [1], [0, 0, 1, 1], [], []>} : vector<256x64xbf16>, vector<64x32xbf16>, vector<256x32xf32> -> vector<256x32xf32>
    %8 = arith.addf %2, %7 : vector<256x32xf32>
    %9 = vector.extract_strided_slice %1 {offsets = [0, 1, 0], sizes = [16, 16, 64], strides = [1, 1, 1]} : vector<18x18x64xbf16> to vector<16x16x64xbf16>
    %10 = vector.shape_cast %9 : vector<16x16x64xbf16> to vector<256x64xbf16>
    %c1 = arith.constant 1 : index
    %c0_7 = arith.constant 0 : index
    %c0_8 = arith.constant 0 : index
    %11 = vector.load %arg2[%c1, %c0_7, %c0_8] : memref<9x64x32xbf16, #tpu.memory_space<vmem>>, vector<1x64x32xbf16>
    %12 = vector.shape_cast %11 : vector<1x64x32xbf16> to vector<64x32xbf16>
    %cst_9 = arith.constant dense<0.000000e+00> : vector<256x32xf32>
    %13 = tpu.matmul %10, %12, %cst_9 {dimension_numbers = #tpu.dot_dimension_numbers<[1], [0], [0], [1], [0, 0, 1, 1], [], []>} : vector<256x64xbf16>, vector<64x32xbf16>, vector<256x32xf32> -> vector<256x32xf32>
    %14 = arith.addf %8, %13 : vector<256x32xf32>
    %15 = vector.extract_strided_slice %1 {offsets = [0, 2, 0], sizes = [16, 16, 64], strides = [1, 1, 1]} : vector<18x18x64xbf16> to vector<16x16x64xbf16>
    %16 = vector.shape_cast %15 : vector<16x16x64xbf16> to vector<256x64xbf16>
    %c2 = arith.constant 2 : index
    %c0_10 = arith.constant 0 : index
    %c0_11 = arith.constant 0 : index
    %17 = vector.load %arg2[%c2, %c0_10, %c0_11] : memref<9x64x32xbf16, #tpu.memory_space<vmem>>, vector<1x64x32xbf16>
    %18 = vector.shape_cast %17 : vector<1x64x32xbf16> to vector<64x32xbf16>
    %cst_12 = arith.constant dense<0.000000e+00> : vector<256x32xf32>
    %19 = tpu.matmul %16, %18, %cst_12 {dimension_numbers = #tpu.dot_dimension_numbers<[1], [0], [0], [1], [0, 0, 1, 1], [], []>} : vector<256x64xbf16>, vector<64x32xbf16>, vector<256x32xf32> -> vector<256x32xf32>
    %20 = arith.addf %14, %19 : vector<256x32xf32>
    %21 = vector.extract_strided_slice %1 {offsets = [1, 0, 0], sizes = [16, 16, 64], strides = [1, 1, 1]} : vector<18x18x64xbf16> to vector<16x16x64xbf16>
    %22 = vector.shape_cast %21 : vector<16x16x64xbf16> to vector<256x64xbf16>
    %c3 = arith.constant 3 : index
    %c0_13 = arith.constant 0 : index
    %c0_14 = arith.constant 0 : index
    %23 = vector.load %arg2[%c3, %c0_13, %c0_14] : memref<9x64x32xbf16, #tpu.memory_space<vmem>>, vector<1x64x32xbf16>
    %24 = vector.shape_cast %23 : vector<1x64x32xbf16> to vector<64x32xbf16>
    %cst_15 = arith.constant dense<0.000000e+00> : vector<256x32xf32>
    %25 = tpu.matmul %22, %24, %cst_15 {dimension_numbers = #tpu.dot_dimension_numbers<[1], [0], [0], [1], [0, 0, 1, 1], [], []>} : vector<256x64xbf16>, vector<64x32xbf16>, vector<256x32xf32> -> vector<256x32xf32>
    %26 = arith.addf %20, %25 : vector<256x32xf32>
    %27 = vector.extract_strided_slice %1 {offsets = [1, 1, 0], sizes = [16, 16, 64], strides = [1, 1, 1]} : vector<18x18x64xbf16> to vector<16x16x64xbf16>
    %28 = vector.shape_cast %27 : vector<16x16x64xbf16> to vector<256x64xbf16>
    %c4 = arith.constant 4 : index
    %c0_16 = arith.constant 0 : index
    %c0_17 = arith.constant 0 : index
    %29 = vector.load %arg2[%c4, %c0_16, %c0_17] : memref<9x64x32xbf16, #tpu.memory_space<vmem>>, vector<1x64x32xbf16>
    %30 = vector.shape_cast %29 : vector<1x64x32xbf16> to vector<64x32xbf16>
    %cst_18 = arith.constant dense<0.000000e+00> : vector<256x32xf32>
    %31 = tpu.matmul %28, %30, %cst_18 {dimension_numbers = #tpu.dot_dimension_numbers<[1], [0], [0], [1], [0, 0, 1, 1], [], []>} : vector<256x64xbf16>, vector<64x32xbf16>, vector<256x32xf32> -> vector<256x32xf32>
    %32 = arith.addf %26, %31 : vector<256x32xf32>
    %33 = vector.extract_strided_slice %1 {offsets = [1, 2, 0], sizes = [16, 16, 64], strides = [1, 1, 1]} : vector<18x18x64xbf16> to vector<16x16x64xbf16>
    %34 = vector.shape_cast %33 : vector<16x16x64xbf16> to vector<256x64xbf16>
    %c5 = arith.constant 5 : index
    %c0_19 = arith.constant 0 : index
    %c0_20 = arith.constant 0 : index
    %35 = vector.load %arg2[%c5, %c0_19, %c0_20] : memref<9x64x32xbf16, #tpu.memory_space<vmem>>, vector<1x64x32xbf16>
    %36 = vector.shape_cast %35 : vector<1x64x32xbf16> to vector<64x32xbf16>
    %cst_21 = arith.constant dense<0.000000e+00> : vector<256x32xf32>
    %37 = tpu.matmul %34, %36, %cst_21 {dimension_numbers = #tpu.dot_dimension_numbers<[1], [0], [0], [1], [0, 0, 1, 1], [], []>} : vector<256x64xbf16>, vector<64x32xbf16>, vector<256x32xf32> -> vector<256x32xf32>
    %38 = arith.addf %32, %37 : vector<256x32xf32>
    %39 = vector.extract_strided_slice %1 {offsets = [2, 0, 0], sizes = [16, 16, 64], strides = [1, 1, 1]} : vector<18x18x64xbf16> to vector<16x16x64xbf16>
    %40 = vector.shape_cast %39 : vector<16x16x64xbf16> to vector<256x64xbf16>
    %c6 = arith.constant 6 : index
    %c0_22 = arith.constant 0 : index
    %c0_23 = arith.constant 0 : index
    %41 = vector.load %arg2[%c6, %c0_22, %c0_23] : memref<9x64x32xbf16, #tpu.memory_space<vmem>>, vector<1x64x32xbf16>
    %42 = vector.shape_cast %41 : vector<1x64x32xbf16> to vector<64x32xbf16>
    %cst_24 = arith.constant dense<0.000000e+00> : vector<256x32xf32>
    %43 = tpu.matmul %40, %42, %cst_24 {dimension_numbers = #tpu.dot_dimension_numbers<[1], [0], [0], [1], [0, 0, 1, 1], [], []>} : vector<256x64xbf16>, vector<64x32xbf16>, vector<256x32xf32> -> vector<256x32xf32>
    %44 = arith.addf %38, %43 : vector<256x32xf32>
    %45 = vector.extract_strided_slice %1 {offsets = [2, 1, 0], sizes = [16, 16, 64], strides = [1, 1, 1]} : vector<18x18x64xbf16> to vector<16x16x64xbf16>
    %46 = vector.shape_cast %45 : vector<16x16x64xbf16> to vector<256x64xbf16>
    %c7 = arith.constant 7 : index
    %c0_25 = arith.constant 0 : index
    %c0_26 = arith.constant 0 : index
    %47 = vector.load %arg2[%c7, %c0_25, %c0_26] : memref<9x64x32xbf16, #tpu.memory_space<vmem>>, vector<1x64x32xbf16>
    %48 = vector.shape_cast %47 : vector<1x64x32xbf16> to vector<64x32xbf16>
    %cst_27 = arith.constant dense<0.000000e+00> : vector<256x32xf32>
    %49 = tpu.matmul %46, %48, %cst_27 {dimension_numbers = #tpu.dot_dimension_numbers<[1], [0], [0], [1], [0, 0, 1, 1], [], []>} : vector<256x64xbf16>, vector<64x32xbf16>, vector<256x32xf32> -> vector<256x32xf32>
    %50 = arith.addf %44, %49 : vector<256x32xf32>
    %51 = vector.extract_strided_slice %1 {offsets = [2, 2, 0], sizes = [16, 16, 64], strides = [1, 1, 1]} : vector<18x18x64xbf16> to vector<16x16x64xbf16>
    %52 = vector.shape_cast %51 : vector<16x16x64xbf16> to vector<256x64xbf16>
    %c8 = arith.constant 8 : index
    %c0_28 = arith.constant 0 : index
    %c0_29 = arith.constant 0 : index
    %53 = vector.load %arg2[%c8, %c0_28, %c0_29] : memref<9x64x32xbf16, #tpu.memory_space<vmem>>, vector<1x64x32xbf16>
    %54 = vector.shape_cast %53 : vector<1x64x32xbf16> to vector<64x32xbf16>
    %cst_30 = arith.constant dense<0.000000e+00> : vector<256x32xf32>
    %55 = tpu.matmul %52, %54, %cst_30 {dimension_numbers = #tpu.dot_dimension_numbers<[1], [0], [0], [1], [0, 0, 1, 1], [], []>} : vector<256x64xbf16>, vector<64x32xbf16>, vector<256x32xf32> -> vector<256x32xf32>
    %56 = arith.addf %50, %55 : vector<256x32xf32>
    %c0_31 = arith.constant 0 : index
    %c0_32 = arith.constant 0 : index
    %57 = vector.load %arg3[%c0_31, %c0_32] : memref<1x32xf32, #tpu.memory_space<vmem>>, vector<1x32xf32>
    %58 = vector.broadcast %57 : vector<1x32xf32> to vector<256x32xf32>
    %59 = arith.addf %56, %58 : vector<256x32xf32>
    %cst_33 = arith.constant 0.000000e+00 : f32
    %60 = vector.broadcast %cst_33 : f32 to vector<256x32xf32>
    %61 = arith.maximumf %59, %60 : vector<256x32xf32>
    %c0_34 = arith.constant 0 : index
    %c0_35 = arith.constant 0 : index
    %c0_36 = arith.constant 0 : index
    %c0_37 = arith.constant 0 : index
    %62 = vector.load %arg4[%c0_34, %c0_35, %c0_36, %c0_37] : memref<1x16x16x32xf32, #tpu.memory_space<vmem>>, vector<1x16x16x32xf32>
    %63 = vector.shape_cast %62 : vector<1x16x16x32xf32> to vector<256x32xf32>
    %64 = arith.addf %61, %63 : vector<256x32xf32>
    %65 = vector.shape_cast %64 : vector<256x32xf32> to vector<1x16x16x32xf32>
    %c0_38 = arith.constant 0 : index
    %c0_39 = arith.constant 0 : index
    %c0_40 = arith.constant 0 : index
    %c0_41 = arith.constant 0 : index
    %66 = vector.load %arg5[%c0_38, %c0_39, %c0_40, %c0_41] : memref<1x16x16x32xf32, #tpu.memory_space<vmem>>, vector<1x16x16x32xf32>
    tpu.vector_store %arg5[%c0_38, %c0_39, %c0_40, %c0_41], %65 {strides = array<i32>} : memref<1x16x16x32xf32, #tpu.memory_space<vmem>>, vector<1x16x16x32xf32>,
    return
  }
  func.func @transform_0(%arg0: i32) -> (i32, i32, i32, i32) {
    %c0_i32 = arith.constant 0 : i32
    %c0_i32_0 = arith.constant 0 : i32
    %c0_i32_1 = arith.constant 0 : i32
    %c0_i32_2 = arith.constant 0 : i32
    return %arg0, %c0_i32, %c0_i32_0, %c0_i32_1 : i32, i32, i32, i32
  }
  func.func @transform_1(%arg0: i32) -> (i32, i32, i32) {
    %c0_i32 = arith.constant 0 : i32
    %c0_i32_0 = arith.constant 0 : i32
    %c0_i32_1 = arith.constant 0 : i32
    %c0_i32_2 = arith.constant 0 : i32
    return %c0_i32, %c0_i32_0, %c0_i32_1 : i32, i32, i32
  }
  func.func @transform_2(%arg0: i32) -> (i32, i32) {
    %c0_i32 = arith.constant 0 : i32
    %c0_i32_0 = arith.constant 0 : i32
    %c0_i32_1 = arith.constant 0 : i32
    return %c0_i32, %c0_i32_0 : i32, i32
  }
  func.func @transform_3(%arg0: i32) -> (i32, i32, i32, i32) {
    %c0_i32 = arith.constant 0 : i32
    %c0_i32_0 = arith.constant 0 : i32
    %c0_i32_1 = arith.constant 0 : i32
    %c0_i32_2 = arith.constant 0 : i32
    return %arg0, %c0_i32, %c0_i32_0, %c0_i32_1 : i32, i32, i32, i32
  }
  func.func @transform_4(%arg0: i32) -> (i32, i32, i32, i32) {
    %c0_i32 = arith.constant 0 : i32
    %c0_i32_0 = arith.constant 0 : i32
    %c0_i32_1 = arith.constant 0 : i32
    %c0_i32_2 = arith.constant 0 : i32
    return %arg0, %c0_i32, %c0_i32_0, %c0_i32_1 : i32, i32, i32, i32
  }
}

</mosaic_0001>

<bundles_post_ra>
// kernel: gab_forward.1
= control target key start
LH: loop header
LB: loop body
LE: loop exit
PB: predicated region body
PF: predicated region fallthrough
CT: control target
= control target key end

     0   :  { %9 = vsyncpa [#allocation3], 0  ;;  %s6065_s0 = inlined_call_operand.vmem [shape: bf16[2,18,18,64], index: 0, kind: input, shape index: {}]   ;;  %s6066_s1 = inlined_call_operand.vmem [shape: bf16[9,64,32], index: 1, kind: input, shape index: {}]   ;;  %s6067_s2 = inlined_call_operand.vmem [shape: f32[1,32], index: 2, kind: input, shape index: {}]   ;;  %s6068_s3 = inlined_call_operand.vmem [shape: f32[2,16,16,32], index: 3, kind: input, shape index: {}]   ;;  %s6069_s4 = inlined_call_operand.hbm [shape: f32[2,16,16,32], index: 4, kind: output, shape index: {}]  }
   0x1   :  { %11 = vsyncpa [#allocation3 + $0x1], 0  ;;  %s4770_s15 = smov 0   ;;  %s4772_s16 = smov 0  }
   0x2   :  { %s4774_s17 = smov 0   ;;  %s4776_s18 = smov 0  }
   0x3 LB: > { %s4791_s19 = sadd.s32 4294967295, %s4740_s18   ;;  %s3439_s20 = sadd.s32 4294967294, %s4740_s18   ;;  %s4740_s18 = sphi %s4776_s18, %s6149_s18   ;;  %s4736_s17 = sphi %s4774_s17, %s6148_s17   ;;  %s4732_s16 = sphi %s4772_s16, %s6147_s16   ;;  %s4728_s15 = sphi %s4770_s15, %s6146_s15  }
   0x4   : > { %s4795_s21 = sadd.s32 1, %s4740_s18   ;;  %s118_s22 = sadd.s32 1, %s4736_s17 }
   0x5   : > { %s115_s23 = ssub.s32 %s4740_s18, %s4795_s21  ;;  %p128_p0 = scmp.ne.s32.totalorder %s4736_s17, %s4732_s16 }
   0x6   : > { %p116_p1 = scmp.eq.s32.totalorder %s115_s23, 0  ;;  %p129_p2 = scmp.eq.s32.totalorder %s4791_s19, 1 }
   0x7   : > { %p134_p3 = scmp.ne.s32.totalorder %s4732_s16, %s4728_s15  ;;  %p135_p4 = scmp.eq.s32.totalorder %s3439_s20, 1 }
   0x8   : > { %s4806_s24 = scalar_select %p116_p1, %s4736_s17, %s118_s22  }
   0x9   : > { %p4808_p5 = por %p129_p2, %p128_p0  ;;  %p4812_p6 = por %p135_p4, %p134_p3 }
   0xa   : > { %p3442_p7 = scmp.ge.s32.totalorder %s4740_s18, 1  ;;  %p175_p8 = scmp.lt.s32.totalorder %s4740_s18, 3 }
   0xc   : > { %p176_p9 = pnand %p3442_p7, %p175_p8 }
   0xe   : > { %179 = sbr.rel (%p176_p9) target bundleno = 578 (0x242), region = 36 }
  0x15   : > { %v4617_v0 = vld [vmem:[%s6066_s1 + $0x20] sm:$0xff]   ;;  %p206_p10 = scmp.lt.s32.totalorder %s4791_s19, 1  ;;  %v4619_v2 = vld [vmem:[%s6066_s1 + $0x28] sm:$0xff]   ;;  %v4621_v4 = vld [vmem:[%s6066_s1 + $0x30] sm:$0xff]   ;;  %vm279_vm0 = vsmask.f32 3328 }
  0x16   : > { %v4618_v1 = vld [vmem:[%s6066_s1 + $0x80] sm:$0xff]   ;;  %3951 = vmatprep.subr.bf16.mxu1 %v4617_v0  ;;  %v4620_v3 = vld [vmem:[%s6066_s1 + $0x88] sm:$0xff]   ;;  %v4622_v5 = vld [vmem:[%s6066_s1 + $0x90] sm:$0xff]   ;;  %vm280_vm1 = vsmask.f32 7440  ;;  %vm747_vm2 = vcmask 523264  }
  0x17   : > { %s4829_s7 = scalar_select %p206_p10, %s4791_s19, 1  ;;  %4111 = vmatprep.subr.bf16.mxu0 %v4618_v1  ;;  %3952 = vmatpush3.bf16.msra.mxu1 %v4617_v0  ;;  %v4623_v6 = vld [vmem:[%s6066_s1 + $0x38] sm:$0xff]   ;;  %v4866_v18 = vld [vmem:[%s6066_s1] sm:$0xff]   ;;  %vm4886_vm3 = vmor %vm279_vm0, %vm280_vm1  ;;  %vm1286_vm4 = vcmask 1042432   ;;  %vm1287_vm5 = vcmask 1046532   ;;  %vm3318_vm7 = vcmask 261120  }
  0x18   : > { %4112 = vmatpush3.bf16.msra.mxu0 %v4618_v1  ;;  %3953 = vmatprep.subr.bf16.mxu1 %v4619_v2  ;;  %v4624_v7 = vld [vmem:[%s6066_s1 + $0x98] sm:$0xff]   ;;  %v4874_v23 = vld [vmem:[%s6066_s1 + $0xa0] sm:$0xff]   ;;  %vm5093_vm6 = vmor %vm1286_vm4, %vm1287_vm5  ;;  %s203_s10 = sand.u32 1, %s4732_s16   ;;  %s3770_s23 = sshll.u32 %s4791_s19, 12 }
  0x19   : > { %s4575_s12 = smul.u32 216, %s4829_s7  ;;  %4113 = vmatprep.subr.bf16.mxu0 %v4620_v3  ;;  %s3769_s9 = sshll.u32 %s4829_s7, 8 }
  0x1a   : > { %s5871_s20 = scalar_lea.vmem %s6068_s3, %s3769_s9  ;;  %s3443_s7 = sshll.u32 %s203_s10, 8 }
  0x1b   : > { %s4847_s28 = scalar_lea.vmem %s6065_s0, %s4575_s12  ;;  %3954 = vmatpush3.bf16.msra.mxu1 %v4619_v2  ;;  %s5883_s22 = scalar_lea.vmem [#allocation2], %s3443_s7 }
  0x1c   : > { %4114 = vmatpush3.bf16.msra.mxu0 %v4620_v3  ;;  %3955 = vmatprep.subr.bf16.mxu1 %v4621_v4  ;;  %v4853_v8 = vld [vmem:[%s4847_s28] sm:$0xf]  ;;  %v4856_v9 = vld [vmem:[%s4847_s28 + $0x4] sm:$0xf]  ;;  %v219_v10 = vld [vmem:[%s4847_s28 + $0x8] sm:$0x1]  ;;  %s6012_s5 = scalar_lea.hbm %s6069_s4, %s3770_s23 }
  0x1d   : > { %4115 = vmatprep.subr.bf16.mxu0 %v4622_v5  ;;  %v283_v11 = vshrl.u32 %v4853_v8, 16  ;;  %v286_v12 = vshll.u32 %v4853_v8, 16  ;;  %v292_v13 = vshll.u32 %v4856_v9, 16  ;;  %v296_v14 = vshrl.u32 %v4856_v9, 16  ;;  %v4869_v22 = vld [vmem:[%s4847_s28 + $0xc] sm:$0xf] }
  0x1e   : > { %v302_v15 = vshll.u32 %v219_v10, 16  ;;  %v4877_v25 = vld [vmem:[%s4847_s28 + $0x10] sm:$0xf]  ;;  %v4880_v26 = vld [vmem:[%s4847_s28 + $0x14] sm:$0x1]  ;;  %v307_v27 = vshrl.u32 %v4869_v22, 16 }
  0x1f   : > { %3956 = vmatpush3.bf16.msra.mxu1 %v4621_v4  ;;  %v285_v16 = vrot.slane %v283_v11, 4  ;;  %v288_v17 = vrot.slane %v286_v12, 5  ;;  %v294_v19 = vrot.slane %v292_v13, 5  ;;  %v298_v20 = vrot.slane %v296_v14, 4  ;;  %v4899_v42 = vld [vmem:[%s4847_s28 + $0x18] sm:$0xf] }
  0x20   : > { %4116 = vmatpush3.bf16.msra.mxu0 %v4622_v5  ;;  %3957 = vmatprep.subr.bf16.mxu1 %v4623_v6  ;;  %v304_v21 = vrot.slane %v302_v15, 5  ;;  %v310_v28 = vshll.u32 %v4869_v22, 16  ;;  %v316_v31 = vshll.u32 %v4877_v25, 16  ;;  %v320_v32 = vshrl.u32 %v4877_v25, 16  ;;  %v4906_v46 = vld [vmem:[%s4847_s28 + $0x1c] sm:$0xf] }
  0x21   : > { %4117 = vmatprep.subr.bf16.mxu0 %v4624_v7  ;;  %v289_v24 = vor.u32 %v288_v17, %v285_v16  ;;  %v299_v30 = vor.u32 %v298_v20, %v294_v19  ;;  %v326_v33 = vshll.u32 %v4880_v26, 16  ;;  %v309_v35 = vrot.slane %v307_v27, 4  ;;  %v4909_v47 = vld [vmem:[%s4847_s28 + $0x20] sm:$0x1]  ;;  %v4917_v53 = vld [vmem:[%s4847_s28 + $0x24] sm:$0xf] }
  0x22   : > { %v312_v36 = vrot.slane %v310_v28, 5  ;;  %v4895_v37 = vcombine.low %v4869_v22, %v4877_v25  ;;  %v318_v39 = vrot.slane %v316_v31, 5  ;;  %v322_v40 = vrot.slane %v320_v32, 4  ;;  %v4920_v54 = vld [vmem:[%s4847_s28 + $0x28] sm:$0xf]  ;;  %s3365_s27 = sshll.u32 %s5883_s22, 4  ;;  %s6014_s27 = int_to_ptr.vmem [resolvable:$true] %s3365_s27 }
  0x23   : > { %3958 = vmatpush3.bf16.msra.mxu1 %v4623_v6  ;;  %v290_v34 = vrot.slane %v289_v24, 4  ;;  %v300_v38 = vrot.slane %v299_v30, 4  ;;  %v328_v41 = vrot.slane %v326_v33, 5  ;;  %v1301_v45 = vrot.slane %v4880_v26, 5  ;;  %v4924_v59 = vld [vmem:[%s4847_s28 + $0x2c] sm:$0x1] }
  0x24   : > { %4118 = vmatpush3.bf16.msra.mxu0 %v4624_v7  ;;  %3991 = vmatprep.subr.bf16.mxu1 %v4866_v18  ;;  %v313_v44 = vor.u32 %v312_v36, %v309_v35  ;;  %v331_v48 = vshrl.u32 %v4899_v42, 16  ;;  %v323_v50 = vor.u32 %v322_v40, %v318_v39  ;;  %v334_v51 = vshll.u32 %v4899_v42, 16  ;;  %v4936_v10 = vld [vmem:[%s4847_s28 + $0x30] sm:$0xf]  ;;  %v4629_v11 = vld [vmem:[%s6066_s1 + $0x8] sm:$0xff]   ;;  %s6024_s19 = scalar_lea.sflag [#allocation3], %s203_s10 }
  0x25   : > { %v295_v43 = vsel %vm4886_vm3, %v290_v34, %v294_v19  ;;  %4151 = vmatprep.subr.bf16.mxu0 %v4874_v23  ;;  %v305_v49 = vsel %vm4886_vm3, %v300_v38, %v304_v21  ;;  %v340_v52 = vshll.u32 %v4906_v46, 16  ;;  %v344_v58 = vshrl.u32 %v4906_v46, 16  ;;  %v4944_v16 = vld [vmem:[%s4847_s28 + $0x34] sm:$0xf]  ;;  %v4951_v30 = vld [vmem:[%s4847_s28 + $0x38] sm:$0x1] }
  0x26   : > { %v3455_v55 = vcombine.low %v295_v43, %v305_v49  ;;  %v314_v56 = vrot.slane %v313_v44, 4  ;;  %v333_v57 = vrot.slane %v331_v48, 4  ;;  %v324_v60 = vrot.slane %v323_v50, 4  ;;  %v4959_v36 = vld [vmem:[%s4847_s28 + $0x3c] sm:$0xf]  ;;  %v4628_v40 = vld [vmem:[%s6066_s1 + $0xa8] sm:$0xff]  }
  0x27   : > { %v336_v61 = vrot.slane %v334_v51, 5  ;;  %v342_v62 = vrot.slane %v340_v52, 5  ;;  %v350_v63 = vshll.u32 %v4909_v47, 16  ;;  %v346_v1 = vrot.slane %v344_v58, 4  ;;  %v4632_v43 = vld [vmem:[%s6066_s1 + $0x10] sm:$0xff]   ;;  %s4678_s6 = scalar_lea.vmem %s6014_s27, 4096 }
  0x28   : > { %3959 = vmatprep.mubr.msk.bf16.mxu1 %vm747_vm2, %v3455_v55  ;;  %v319_v0 = vsel %vm4886_vm3, %v314_v56, %v318_v39  ;;  %v1305_v2 = vrot.slane %v4906_v46, 5  ;;  %v1308_v3 = vrot.slane %v4909_v47, 5  ;;  %v329_v4 = vsel %vm4886_vm3, %v324_v60, %v328_v41  ;;  %v4974_v51 = vld [vmem:[%s4847_s28 + $0x40] sm:$0xf]  ;;  %p4679_p11 = scmp.ne.s32.totalorder %s6014_s27, %s4678_s6 }
  0x29   : > { %v337_v5 = vor.u32 %v336_v61, %v333_v57  ;;  %v352_v6 = vrot.slane %v350_v63, 5  ;;  %v355_v7 = vshrl.u32 %v4917_v53, 16  ;;  %v3456_v12 = vcombine.low %v319_v0, %v329_v4 }
  0x2a   : > { %v347_v13 = vor.u32 %v346_v1, %v342_v62  ;;  %v358_v14 = vshll.u32 %v4917_v53, 16  ;;  %v364_v15 = vshll.u32 %v4920_v54, 16  ;;  %v368_v20 = vshrl.u32 %v4920_v54, 16  ;;  %p4680_p12 = pnand %p4679_p11, %p4808_p5 }
  0x2b   : > { %v338_v17 = vrot.slane %v337_v5, 4  ;;  %v357_v19 = vrot.slane %v355_v7, 4  ;;  %v374_v21 = vshll.u32 %v4924_v59, 16  ;;  %4119 = vmatprep.mubr.msk.bf16.mxu0 %vm747_vm2, %v3456_v12  ;;  %3960 = vmatmul.mubr.msk.bf16.vlgmr.msra.gmra.mrb[0].mxu1 %vm747_vm2, %v3456_v12  ;;  %v379_v31 = vshrl.u32 %v4936_v10, 16 }
  0x2c   : > { %v348_v24 = vrot.slane %v347_v13, 4  ;;  %v360_v27 = vrot.slane %v358_v14, 5  ;;  %v366_v28 = vrot.slane %v364_v15, 5  ;;  %3992 = vmatpush3.bf16.msra.mxu1 %v4866_v18  ;;  %v370_v33 = vrot.slane %v368_v20, 4  ;;  %v4999_v15 = vld [vmem:[%s4847_s28 + $0x4c] sm:$0xf]  ;;  %p4681_p13 = pneg %p4680_p12 }
  0x2d   : > { %v343_v32 = vsel %vm4886_vm3, %v338_v17, %v342_v62  ;;  %v376_v34 = vrot.slane %v374_v21, 5  ;;  %v382_v35 = vshll.u32 %v4936_v10, 16  ;;  %v381_v41 = vrot.slane %v379_v31, 4  ;;  %3993 = vmatprep.subr.bf16.mxu1 %v4629_v11  ;;  %v4983_v62 = vld [vmem:[%s4847_s28 + $0x44] sm:$0x1]  ;;  %v4634_v21 = vld [vmem:[%s6066_s1 + $0x18] sm:$0xff]  }
  0x2e   : > { %v353_v38 = vsel %vm4886_vm3, %v348_v24, %v352_v6  ;;  %v361_v39 = vor.u32 %v360_v27, %v357_v19  ;;  %v388_v18 = vshll.u32 %v4944_v16, 16  ;;  %v371_v48 = vor.u32 %v370_v33, %v366_v28  ;;  %v4991_v6 = vld [vmem:[%s4847_s28 + $0x48] sm:$0xf]  ;;  %v5011_v31 = vld [vmem:[%s4847_s28 + $0x50] sm:$0x1] }
  0x2f   : > { %v4970_v44 = vcombine.low %v343_v32, %v353_v38  ;;  %v384_v49 = vrot.slane %v382_v35, 5  ;;  %v392_v50 = vshrl.u32 %v4944_v16, 16  ;;  %v398_v56 = vshll.u32 %v4951_v30, 16 }
  0x30   : > { %v362_v52 = vrot.slane %v361_v39, 4  ;;  %v390_v55 = vrot.slane %v388_v18, 5  ;;  %v403_v57 = vshrl.u32 %v4959_v36, 16  ;;  %v372_v58 = vrot.slane %v371_v48, 4  ;;  %3994 = vmatpush3.bf16.msra.mxu1 %v4629_v11  ;;  %v5021_v39 = vld [vmem:[%s4847_s28 + $0x54] sm:$0xf] }
  0x31   : > { %6104 = vst [vmem:[#allocation5_spill] sm:$0xff] %v4970_v44  ;;  %4120 = vmatmul.mubr.msk.bf16.vlgmr.msra.gmra.mrb[0].mxu0 %vm747_vm2, %v4970_v44  ;;  %3963 = vmatprep.mubr.msk.bf16.mxu1 %vm747_vm2, %v4970_v44  ;;  %v385_v60 = vor.u32 %v384_v49, %v381_v41  ;;  %v394_v61 = vrot.slane %v392_v50, 4  ;;  %v406_v63 = vshll.u32 %v4959_v36, 16  ;;  %v400_v1 = vrot.slane %v398_v56, 5  ;;  %6106 = vst [vmem:[#allocation7_spill] sm:$0xff] %v5021_v39  ;;  %v4631_v41 = vld [vmem:[%s6066_s1 + $0xb8] sm:$0xff]  }
  0x32   : > { %4152 = vmatpush3.bf16.msra.mxu0 %v4874_v23  ;;  %v367_v0 = vsel %vm4886_vm3, %v362_v52, %v366_v28  ;;  %v405_v4 = vrot.slane %v403_v57, 4  ;;  %v412_v5 = vshll.u32 %v4974_v51, 16  ;;  %v377_v7 = vsel %vm4886_vm3, %v372_v58, %v376_v34  ;;  %v4630_v23 = vld [vmem:[%s6066_s1 + $0xb0] sm:$0xff]   ;;  %3995 = vmatprep.subr.bf16.mxu1 %v4632_v43  ;;  %v5030_v52 = vld [vmem:[%s4847_s28 + $0x58] sm:$0xf] }
  0x33   : > { %4153 = vmatprep.subr.bf16.mxu0 %v4628_v40  ;;  %v386_v12 = vrot.slane %v385_v60, 4  ;;  %v395_v13 = vor.u32 %v394_v61, %v390_v55  ;;  %v408_v14 = vrot.slane %v406_v63, 5  ;;  %v5001_v17 = vcombine.low %v367_v0, %v377_v7  ;;  %v5040_v61 = vld [vmem:[%s4847_s28 + $0x5c] sm:$0x1] }
  0x34   : > { %v414_v11 = vrot.slane %v412_v5, 5  ;;  %v416_v19 = vshrl.u32 %v4974_v51, 16  ;;  %v422_v20 = vshll.u32 %v4983_v62, 16  ;;  %v427_v32 = vshrl.u32 %v4991_v6, 16  ;;  %3996 = vmatpush3.bf16.msra.mxu1 %v4632_v43 }
  0x35   : > { %6105 = vst [vmem:[#allocation6_spill] sm:$0xff] %v5001_v17  ;;  %v391_v24 = vsel %vm4886_vm3, %v386_v12, %v390_v55  ;;  %v396_v27 = vrot.slane %v395_v13, 4  ;;  %v409_v28 = vor.u32 %v408_v14, %v405_v4  ;;  %4123 = vmatprep.mubr.msk.bf16.mxu0 %vm747_vm2, %v5001_v17  ;;  %3964 = vmatmul.mubr.msk.bf16.gmra.mrb[4].mxu1 %vm747_vm2, %v5001_v17  ;;  %v430_v35 = vshll.u32 %v4991_v6, 16  ;;  %v5035_v55 = vld [vmem:[%s6066_s1 + $0x40] sm:$0xff]  }
  0x36   : > { %v418_v33 = vrot.slane %v416_v19, 4  ;;  %v424_v34 = vrot.slane %v422_v20, 5  ;;  %v436_v38 = vshll.u32 %v4999_v15, 16  ;;  %4154 = vmatpush3.bf16.msra.mxu0 %v4628_v40  ;;  %v429_v49 = vrot.slane %v427_v32, 4  ;;  %3997 = vmatprep.subr.bf16.mxu1 %v4634_v21  ;;  %v5054_v19 = vld [vmem:[%s4847_s28 + $0x60] sm:$0xf] }
  0x37   : > { %v401_v18 = vsel %vm4886_vm3, %v396_v27, %v400_v1  ;;  %v410_v48 = vrot.slane %v409_v28, 4  ;;  %v440_v50 = vshrl.u32 %v4999_v15, 16  ;;  %4155 = vmatprep.subr.bf16.mxu0 %v4630_v23  ;;  %v432_v58 = vrot.slane %v430_v35, 5  ;;  %v5059_v32 = vld [vmem:[%s4847_s28 + $0x64] sm:$0xf] }
  0x38   : > { %v5037_v56 = vcombine.low %v391_v24, %v401_v18  ;;  %v419_v57 = vor.u32 %v418_v33, %v414_v11  ;;  %v438_v60 = vrot.slane %v436_v38, 5  ;;  %v446_v43 = vshll.u32 %v5011_v31, 16  ;;  %3998 = vmatpush3.bf16.msra.mxu1 %v4634_v21  ;;  %v5068_v21 = vld [vmem:[%s6066_s1 + $0xc0] sm:$0xff]  }
  0x39   : > { %v415_v40 = vsel %vm4886_vm3, %v410_v48, %v414_v11  ;;  %v442_v63 = vrot.slane %v440_v50, 4  ;;  %v451_v0 = vshrl.u32 %v5021_v39, 16  ;;  %v433_v4 = vor.u32 %v432_v58, %v429_v49  ;;  %4031 = vmatprep.subr.bf16.mxu1 %v5035_v55  ;;  %v5073_v48 = vld [vmem:[%s4847_s28 + $0x68] sm:$0x1] }
  0x3a   : > { %6107 = vst [vmem:[#allocation8_spill] sm:$0xff] %v5037_v56  ;;  %4124 = vmatmul.mubr.msk.bf16.gmra.mrb[4].mxu0 %vm747_vm2, %v5037_v56  ;;  %3967 = vmatprep.mubr.msk.bf16.mxu1 %vm747_vm2, %v5037_v56  ;;  %v420_v1 = vrot.slane %v419_v57, 4  ;;  %v454_v5 = vshll.u32 %v5021_v39, 16  ;;  %v460_v7 = vshll.u32 %v5030_v52, 16  ;;  %v448_v13 = vrot.slane %v446_v43, 5 }
  0x3b   : > { %v443_v12 = vor.u32 %v442_v63, %v438_v60  ;;  %4156 = vmatpush3.bf16.msra.mxu0 %v4630_v23  ;;  %v453_v14 = vrot.slane %v451_v0, 4  ;;  %v464_v11 = vshrl.u32 %v5030_v52, 16  ;;  %v434_v24 = vrot.slane %v433_v4, 4  ;;  %v5087_v4 = vld [vmem:[%s4847_s28 + $0x6c] sm:$0xf] }
  0x3c   : > { %v425_v20 = vsel %vm4886_vm3, %v420_v1, %v424_v34  ;;  %v456_v27 = vrot.slane %v454_v5, 5  ;;  %v462_v28 = vrot.slane %v460_v7, 5  ;;  %4157 = vmatprep.subr.bf16.mxu0 %v4631_v41  ;;  %v470_v38 = vshll.u32 %v5040_v61, 16 }
  0x3d   : > { %v5062_v33 = vcombine.low %v415_v40, %v425_v20  ;;  %v444_v23 = vrot.slane %v443_v12, 4  ;;  %v466_v35 = vrot.slane %v464_v11, 4  ;;  %v439_v34 = vsel %vm4886_vm3, %v434_v24, %v438_v60 }
  0x3e   : > { %v457_v18 = vor.u32 %v456_v27, %v453_v14  ;;  %v475_v49 = vshrl.u32 %v5054_v19, 16  ;;  %v478_v50 = vshll.u32 %v5054_v19, 16  ;;  %v472_v40 = vrot.slane %v470_v38, 5  ;;  %v5107_v27 = vld [vmem:[%s4847_s28 + $0x70] sm:$0xf] }
  0x3f   : > { %6108 = vst [vmem:[#allocation9_spill] sm:$0xff] %v5062_v33  ;;  %4127 = vmatprep.mubr.msk.bf16.mxu0 %vm747_vm2, %v5062_v33  ;;  %3968 = vmatmul.mubr.msk.bf16.gmra.mrb[8].mxu1 %vm747_vm2, %v5062_v33  ;;  %v449_v57 = vsel %vm4886_vm3, %v444_v23, %v448_v13  ;;  %v467_v58 = vor.u32 %v466_v35, %v462_v28  ;;  %v484_v60 = vshll.u32 %v5059_v32, 16  ;;  %v488_v12 = vshrl.u32 %v5059_v32, 16 }
  0x40   : > { %v5084_v63 = vcombine.low %v439_v34, %v449_v57  ;;  %v458_v43 = vrot.slane %v457_v18, 4  ;;  %v477_v0 = vrot.slane %v475_v49, 4  ;;  %v480_v1 = vrot.slane %v478_v50, 5  ;;  %4158 = vmatpush3.bf16.msra.mxu0 %v4631_v41  ;;  %v5112_v34 = vld [vmem:[%s4847_s28 + $0x74] sm:$0x1] }
  0x41   : > { %v468_v5 = vrot.slane %v467_v58, 4  ;;  %v486_v7 = vrot.slane %v484_v60, 5  ;;  %v494_v13 = vshll.u32 %v5073_v48, 16  ;;  %4191 = vmatprep.subr.bf16.mxu0 %v5068_v21  ;;  %v3528_v20 = vrot.slane %v4869_v22, 9 }
  0x42   : > { %6109 = vst [vmem:[#allocation10_spill] sm:$0xff] %v5084_v63  ;;  %4128 = vmatmul.mubr.msk.bf16.gmra.mrb[8].mxu0 %vm747_vm2, %v5084_v63  ;;  %3971 = vmatprep.mubr.msk.bf16.mxu1 %vm747_vm2, %v5084_v63  ;;  %v463_v41 = vsel %vm4886_vm3, %v458_v43, %v462_v28  ;;  %v481_v11 = vor.u32 %v480_v1, %v477_v0  ;;  %v1298_v24 = vrot.slane %v4877_v25, 5  ;;  %v490_v35 = vrot.slane %v488_v12, 4 }
  0x43   : > { %v473_v23 = vsel %vm4886_vm3, %v468_v5, %v472_v40  ;;  %v496_v38 = vrot.slane %v494_v13, 5  ;;  %v499_v18 = vshrl.u32 %v5087_v4, 16  ;;  %v502_v58 = vshll.u32 %v5087_v4, 16  ;;  %v5132_v5 = vld [vmem:[%s4847_s28 + $0x78] sm:$0xf] }
  0x44   : > { %v5115_v49 = vcombine.low %v463_v41, %v473_v23  ;;  %v482_v28 = vrot.slane %v481_v11, 4  ;;  %v1299_v22 = vsel %vm5093_vm6, %v3528_v20, %v1298_v24  ;;  %v1300_v50 = vrot.slane %v1298_v24, 4 }
  0x45   : > { %v491_v25 = vor.u32 %v490_v35, %v486_v7  ;;  %v501_v57 = vrot.slane %v499_v18, 4  ;;  %v508_v40 = vshll.u32 %v5107_v27, 16  ;;  %v512_v0 = vshrl.u32 %v5107_v27, 16  ;;  %v5144_v35 = vld [vmem:[%s4847_s28 + $0x7c] sm:$0xf] }
  0x46   : > { %6112 = vst [vmem:[#allocation11_spill] sm:$0xff] %v5115_v49  ;;  %4131 = vmatprep.mubr.msk.bf16.mxu0 %vm747_vm2, %v5115_v49  ;;  %v487_v60 = vsel %vm4886_vm3, %v482_v28, %v486_v7  ;;  %v1302_v43 = vsel %vm5093_vm6, %v1300_v50, %v1301_v45  ;;  %v518_v1 = vshll.u32 %v5112_v34, 16  ;;  %v504_v7 = vrot.slane %v502_v58, 5  ;;  %v5147_v18 = vld [vmem:[%s4847_s28 + $0x80] sm:$0x1] }
  0x47   : > { %3972 = vmatmul.mubr.msk.bf16.gmra.mrb[12].mxu1 %vm747_vm2, %v5115_v49  ;;  %v492_v12 = vrot.slane %v491_v25, 4  ;;  %v5136_v13 = vcombine.low %v1299_v22, %v1302_v43  ;;  %v510_v41 = vrot.slane %v508_v40, 5  ;;  %v514_v26 = vrot.slane %v512_v0, 4 }
  0x48   : > { %v520_v11 = vrot.slane %v518_v1, 5  ;;  %v3529_v20 = vrot.slane %v4899_v42, 9  ;;  %v1307_v45 = vrot.slane %v1305_v2, 4  ;;  %v505_v23 = vor.u32 %v504_v7, %v501_v57  ;;  %v5164_v1 = vld [vmem:[%s4847_s28 + $0x84] sm:$0xf] }
  0x49   : > { %6113 = vst [vmem:[#allocation12_spill] sm:$0xff] %v5136_v13  ;;  %v497_v24 = vsel %vm4886_vm3, %v492_v12, %v496_v38  ;;  %v523_v28 = vshrl.u32 %v5132_v5, 16  ;;  %v526_v22 = vshll.u32 %v5132_v5, 16  ;;  %v515_v25 = vor.u32 %v514_v26, %v510_v41  ;;  %v5174_v12 = vld [vmem:[%s4847_s28 + $0x88] sm:$0xf] }
  0x4a   : > { %v5151_v50 = vcombine.low %v487_v60, %v497_v24  ;;  %v1306_v58 = vsel %vm5093_vm6, %v3529_v20, %v1305_v2  ;;  %v1309_v38 = vsel %vm5093_vm6, %v1307_v45, %v1308_v3  ;;  %v506_v57 = vrot.slane %v505_v23, 4  ;;  %v5177_v7 = vld [vmem:[%s4847_s28 + $0x8c] sm:$0x1] }
  0x4b   : > { %v5161_v40 = vcombine.low %v1306_v58, %v1309_v38  ;;  %v525_v43 = vrot.slane %v523_v28, 4  ;;  %v528_v0 = vrot.slane %v526_v22, 5  ;;  %v516_v60 = vrot.slane %v515_v25, 4 }
  0x4c   : > { %6114 = vst [vmem:[#allocation13_spill] sm:$0xff] %v5151_v50  ;;  %4132 = vmatmul.mubr.msk.bf16.gmra.mrb[12].mxu0 %vm747_vm2, %v5151_v50  ;;  %3975 = vmatprep.mubr.msk.bf16.mxu1 %vm747_vm2, %v5151_v50  ;;  %v532_v2 = vshll.u32 %v5144_v35, 16  ;;  %v536_v47 = vshrl.u32 %v5144_v35, 16  ;;  %v542_v3 = vshll.u32 %v5147_v18, 16  ;;  %v511_v26 = vsel %vm4886_vm3, %v506_v57, %v510_v41 }
  0x4d   : > { %6115 = vst [vmem:[#allocation14_spill] sm:$0xff] %v5161_v40  ;;  %4159 = vmatprep.mubr.msk.bf16.mxu0 %vm747_vm2, %v5136_v13  ;;  %v529_v20 = vor.u32 %v528_v0, %v525_v43  ;;  %v3530_v45 = vrot.slane %v4917_v53, 9  ;;  %v1312_v24 = vrot.slane %v4920_v54, 5  ;;  %v521_v23 = vsel %vm4886_vm3, %v516_v60, %v520_v11 }
  0x4e   : > { %v534_v28 = vrot.slane %v532_v2, 5  ;;  %v538_v22 = vrot.slane %v536_v47, 4  ;;  %v544_v25 = vrot.slane %v542_v3, 5  ;;  %v5187_v58 = vcombine.low %v511_v26, %v521_v23 }
  0x4f   : > { %v530_v38 = vrot.slane %v529_v20, 4  ;;  %v1313_v50 = vsel %vm5093_vm6, %v3530_v45, %v1312_v24  ;;  %v1314_v49 = vrot.slane %v1312_v24, 4  ;;  %v1315_v57 = vrot.slane %v4924_v59, 5  ;;  %v5204_v45 = vld [vmem:[%s4847_s28 + $0x90] sm:$0xf]  ;;  %v4635_v24 = vld [vmem:[%s6066_s1 + $0xc8] sm:$0xff]  }
  0x50   : > { %6116 = vst [vmem:[#allocation15_spill] sm:$0xff] %v5187_v58  ;;  %v539_v41 = vor.u32 %v538_v22, %v534_v28  ;;  %v547_v43 = vshrl.u32 %v5164_v1, 16  ;;  %v550_v0 = vshll.u32 %v5164_v1, 16  ;;  %3976 = vmatmul.mubr.msk.bf16.gmra.mrb[16].mxu1 %vm747_vm2, %v5187_v58  ;;  %v556_v60 = vshll.u32 %v5174_v12, 16  ;;  %v5212_v58 = vld [vmem:[%s4847_s28 + $0x94] sm:$0xf] }
  0x51   : > { %v535_v11 = vsel %vm4886_vm3, %v530_v38, %v534_v28  ;;  %v560_v2 = vshrl.u32 %v5174_v12, 16  ;;  %v566_v47 = vshll.u32 %v5177_v7, 16  ;;  %v1316_v59 = vsel %vm5093_vm6, %v1314_v49, %v1315_v57 }
  0x52   : > { %v540_v3 = vrot.slane %v539_v41, 4  ;;  %v549_v26 = vrot.slane %v547_v43, 4  ;;  %v552_v20 = vrot.slane %v550_v0, 5  ;;  %v5209_v23 = vcombine.low %v1313_v50, %v1316_v59  ;;  %v5221_v0 = vld [vmem:[%s4847_s28 + $0x98] sm:$0x1] }
  0x53   : > { %v558_v28 = vrot.slane %v556_v60, 5  ;;  %v562_v22 = vrot.slane %v560_v2, 4  ;;  %v568_v38 = vrot.slane %v566_v47, 5  ;;  %v3531_v57 = vrot.slane %v4936_v10, 9 }
  0x54   : > { %6117 = vst [vmem:[#allocation16_spill] sm:$0xff] %v5209_v23  ;;  %4160 = vmatmul.mubr.msk.bf16.vlgmr.msra.gmra.mrb[0].mxu0 %vm747_vm2, %v5161_v40  ;;  %v545_v49 = vsel %vm4886_vm3, %v540_v3, %v544_v25  ;;  %v553_v41 = vor.u32 %v552_v20, %v549_v26  ;;  %v1319_v43 = vrot.slane %v4944_v16, 5  ;;  %v1322_v2 = vrot.slane %v4951_v30, 5  ;;  %v5331_v40 = vld [vmem:[%s4847_s28 + $0xbc] sm:$0x1] }
  0x55   : > { %4192 = vmatpush3.bf16.msra.mxu0 %v5068_v21  ;;  %v5224_v50 = vcombine.low %v535_v11, %v545_v49  ;;  %4163 = vmatprep.mubr.msk.bf16.mxu0 %vm747_vm2, %v5209_v23  ;;  %v563_v60 = vor.u32 %v562_v22, %v558_v28  ;;  %v571_v25 = vshrl.u32 %v5204_v45, 16  ;;  %v574_v26 = vshll.u32 %v5204_v45, 16  ;;  %v5234_v21 = vld [vmem:[%s4847_s28 + $0x9c] sm:$0xf]  ;;  %v4638_v11 = vld [vmem:[%s6066_s1 + $0xd0] sm:$0xff]  }
  0x56   : > { %v554_v47 = vrot.slane %v553_v41, 4  ;;  %v1320_v3 = vsel %vm5093_vm6, %v3531_v57, %v1319_v43  ;;  %v1321_v59 = vrot.slane %v1319_v43, 4  ;;  %4193 = vmatprep.subr.bf16.mxu0 %v4635_v24  ;;  %v580_v22 = vshll.u32 %v5212_v58, 16  ;;  %v5244_v41 = vld [vmem:[%s4847_s28 + $0xa0] sm:$0xf] }
  0x57   : > { %6118 = vst [vmem:[#allocation17_spill] sm:$0xff] %v5224_v50  ;;  %3979 = vmatprep.mubr.msk.bf16.mxu1 %vm747_vm2, %v5224_v50  ;;  %v564_v30 = vrot.slane %v563_v60, 4  ;;  %v573_v20 = vrot.slane %v571_v25, 4  ;;  %v584_v49 = vshrl.u32 %v5212_v58, 16  ;;  %v576_v63 = vrot.slane %v574_v26, 5  ;;  %v4643_v60 = vld [vmem:[%s6066_s1 + $0xd8] sm:$0xff]  }
  0x58   : > { %v559_v57 = vsel %vm4886_vm3, %v554_v47, %v558_v28  ;;  %v1323_v43 = vsel %vm5093_vm6, %v1321_v59, %v1322_v2  ;;  %v590_v33 = vshll.u32 %v5221_v0, 16  ;;  %v582_v56 = vrot.slane %v580_v22, 5  ;;  %v5262_v59 = vld [vmem:[%s4847_s28 + $0xa4] sm:$0x1] }
  0x59   : > { %v569_v25 = vsel %vm4886_vm3, %v564_v30, %v568_v38  ;;  %v5256_v50 = vcombine.low %v1320_v3, %v1323_v43  ;;  %v586_v17 = vrot.slane %v584_v49, 4  ;;  %4194 = vmatpush3.bf16.msra.mxu0 %v4635_v24  ;;  %v577_v28 = vor.u32 %v576_v63, %v573_v20 }
  0x5a   : > { %v5258_v44 = vcombine.low %v559_v57, %v569_v25  ;;  %v592_v2 = vrot.slane %v590_v33, 5  ;;  %v3532_v47 = vrot.slane %v4959_v36, 9  ;;  %4195 = vmatprep.subr.bf16.mxu0 %v4638_v11  ;;  %v1326_v23 = vrot.slane %v4974_v51, 5 }
  0x5b   : > { %6119 = vst [vmem:[#allocation18_spill] sm:$0xff] %v5256_v50  ;;  %v587_v26 = vor.u32 %v586_v17, %v582_v56  ;;  %v1329_v38 = vrot.slane %v4983_v62, 5  ;;  %v595_v3 = vshrl.u32 %v5234_v21, 16  ;;  %v578_v63 = vrot.slane %v577_v28, 4  ;;  %v5275_v17 = vld [vmem:[%s4847_s28 + $0xa8] sm:$0xf] }
  0x5c   : > { %6120 = vst [vmem:[#allocation19_spill] sm:$0xff] %v5258_v44  ;;  %3980 = vmatmul.mubr.msk.bf16.gmra.mrb[20].mxu1 %vm747_vm2, %v5258_v44  ;;  %4164 = vmatmul.mubr.msk.bf16.gmra.mrb[4].mxu0 %vm747_vm2, %v5256_v50  ;;  %v598_v33 = vshll.u32 %v5234_v21, 16  ;;  %v604_v24 = vshll.u32 %v5244_v41, 16  ;;  %v608_v30 = vshrl.u32 %v5244_v41, 16  ;;  %v1327_v62 = vsel %vm5093_vm6, %v3532_v47, %v1326_v23  ;;  %v5284_v44 = vld [vmem:[%s6066_s1 + $0xe0] sm:$0xff]  }
  0x5d   : > { %v588_v20 = vrot.slane %v587_v26, 4  ;;  %v1328_v22 = vrot.slane %v1326_v23, 4  ;;  %v597_v49 = vrot.slane %v595_v3, 4  ;;  %4196 = vmatpush3.bf16.msra.mxu0 %v4638_v11  ;;  %v583_v57 = vsel %vm4886_vm3, %v578_v63, %v582_v56  ;;  %6121 = vst [vmem:[#allocation20_spill] sm:$0xff] %v5284_v44  ;;  %v5293_v56 = vld [vmem:[%s4847_s28 + $0xac] sm:$0xf] }
  0x5e   : > { %v600_v43 = vrot.slane %v598_v33, 5  ;;  %v606_v25 = vrot.slane %v604_v24, 5  ;;  %v610_v28 = vrot.slane %v608_v30, 4  ;;  %4197 = vmatprep.subr.bf16.mxu0 %v4643_v60  ;;  %v614_v11 = vshll.u32 %v5262_v59, 16  ;;  %v5300_v30 = vld [vmem:[%s4847_s28 + $0xb0] sm:$0x1] }
  0x5f   : > { %v593_v26 = vsel %vm4886_vm3, %v588_v20, %v592_v2  ;;  %v1330_v23 = vsel %vm5093_vm6, %v1328_v22, %v1329_v38  ;;  %v3533_v47 = vrot.slane %v4991_v6, 9  ;;  %v1333_v2 = vrot.slane %v4999_v15, 5 }
  0x60   : > { %v5295_v3 = vcombine.low %v583_v57, %v593_v26  ;;  %v5297_v63 = vcombine.low %v1327_v62, %v1330_v23  ;;  %v601_v33 = vor.u32 %v600_v43, %v597_v49  ;;  %v611_v24 = vor.u32 %v610_v28, %v606_v25  ;;  %v5312_v43 = vld [vmem:[%s4847_s28 + $0xb4] sm:$0xf] }
  0x61   : > { %v616_v50 = vrot.slane %v614_v11, 5  ;;  %v1336_v38 = vrot.slane %v5011_v31, 5  ;;  %v619_v20 = vshrl.u32 %v5275_v17, 16  ;;  %4198 = vmatpush3.bf16.msra.mxu0 %v4643_v60  ;;  %v622_v49 = vshll.u32 %v5275_v17, 16 }
  0x62   : > { %6122 = vst [vmem:[#allocation21_spill] sm:$0xff] %v5295_v3  ;;  %6123 = vst [vmem:[#allocation22_spill] sm:$0xff] %v5297_v63  ;;  %3983 = vmatprep.mubr.msk.bf16.mxu1 %vm747_vm2, %v5295_v3  ;;  %4167 = vmatprep.mubr.msk.bf16.mxu0 %vm747_vm2, %v5297_v63  ;;  %v602_v62 = vrot.slane %v601_v33, 4  ;;  %v612_v22 = vrot.slane %v611_v24, 4  ;;  %v628_v57 = vshll.u32 %v5293_v56, 16  ;;  %v1334_v31 = vsel %vm5093_vm6, %v3533_v47, %v1333_v2 }
  0x63   : > { %v1335_v60 = vrot.slane %v1333_v2, 4  ;;  %v621_v28 = vrot.slane %v619_v20, 4  ;;  %v632_v26 = vshrl.u32 %v5293_v56, 16  ;;  %4231 = vmatprep.subr.bf16.mxu0 %v5284_v44  ;;  %v624_v33 = vrot.slane %v622_v49, 5  ;;  %v5323_v3 = vld [vmem:[%s4847_s28 + $0xb8] sm:$0xf] }
  0x64   : > { %v607_v23 = vsel %vm4886_vm3, %v602_v62, %v606_v25  ;;  %v617_v11 = vsel %vm4886_vm3, %v612_v22, %v616_v50  ;;  %v630_v24 = vrot.slane %v628_v57, 5  ;;  %v638_v20 = vshll.u32 %v5300_v30, 16 }
  0x65   : > { %v5325_v63 = vcombine.low %v607_v23, %v617_v11  ;;  %v1337_v47 = vsel %vm5093_vm6, %v1335_v60, %v1336_v38  ;;  %v634_v2 = vrot.slane %v632_v26, 4  ;;  %v625_v25 = vor.u32 %v624_v33, %v621_v28 }
  0x66   : > { %v5333_v13 = vcombine.low %v1334_v31, %v1337_v47  ;;  %v3534_v62 = vrot.slane %v5021_v39, 9  ;;  %v1340_v50 = vrot.slane %v5030_v52, 5  ;;  %v640_v49 = vrot.slane %v638_v20, 5 }
  0x67   : > { %6124 = vst [vmem:[#allocation23_spill] sm:$0xff] %v5325_v63  ;;  %3984 = vmatmul.mubr.msk.bf16.gmra.mrb[24].mxu1 %vm747_vm2, %v5325_v63  ;;  %v635_v22 = vor.u32 %v634_v2, %v630_v24  ;;  %v1343_v57 = vrot.slane %v5040_v61, 5  ;;  %v643_v38 = vshrl.u32 %v5312_v43, 16  ;;  %v626_v60 = vrot.slane %v625_v25, 4 }
  0x68   : > { %6125 = vst [vmem:[#allocation24_spill] sm:$0xff] %v5333_v13  ;;  %4168 = vmatmul.mubr.msk.bf16.gmra.mrb[8].mxu0 %vm747_vm2, %v5333_v13  ;;  %v1341_v31 = vsel %vm5093_vm6, %v3534_v62, %v1340_v50  ;;  %v1342_v28 = vrot.slane %v1340_v50, 4  ;;  %v646_v26 = vshll.u32 %v5312_v43, 16  ;;  %v652_v33 = vshll.u32 %v5323_v3, 16 }
  0x69   : > { %v636_v23 = vrot.slane %v635_v22, 4  ;;  %v645_v11 = vrot.slane %v643_v38, 4  ;;  %v656_v47 = vshrl.u32 %v5323_v3, 16  ;;  %v631_v61 = vsel %vm4886_vm3, %v626_v60, %v630_v24 }
  0x6a   : > { %v1344_v2 = vsel %vm5093_vm6, %v1342_v28, %v1343_v57  ;;  %v648_v20 = vrot.slane %v646_v26, 5  ;;  %v662_v25 = vshll.u32 %v5331_v40, 16  ;;  %v654_v22 = vrot.slane %v652_v33, 5 }
  0x6b   : > { %v641_v62 = vsel %vm4886_vm3, %v636_v23, %v640_v49  ;;  %v5355_v50 = vcombine.low %v1341_v31, %v1344_v2  ;;  %v658_v38 = vrot.slane %v656_v47, 4  ;;  %v3535_v39 = vrot.slane %v5054_v19, 9 }
  0x6c   : > { %v5357_v63 = vcombine.low %v631_v61, %v641_v62  ;;  %v649_v13 = vor.u32 %v648_v20, %v645_v11  ;;  %v664_v44 = vrot.slane %v662_v25, 5  ;;  %v1347_v57 = vrot.slane %v5059_v32, 5 }
  0x6d   : > { %4171 = vmatprep.mubr.msk.bf16.mxu0 %vm747_vm2, %v5355_v50  ;;  %v659_v24 = vor.u32 %v658_v38, %v654_v22  ;;  %v1350_v60 = vrot.slane %v5073_v48, 5  ;;  %v3536_v49 = vrot.slane %v5087_v4, 9  ;;  %v3491_v28 = vcombine.low %v4853_v8, %v4856_v9 }
  0x6e   : > { %3987 = vmatprep.mubr.msk.bf16.mxu1 %vm747_vm2, %v5357_v63  ;;  %v650_v31 = vrot.slane %v649_v13, 4  ;;  %v1354_v26 = vrot.slane %v5107_v27, 5  ;;  %v1357_v23 = vrot.slane %v5112_v34, 5  ;;  %v1348_v33 = vsel %vm5093_vm6, %v3535_v39, %v1347_v57 }
  0x6f   : > { %v660_v11 = vrot.slane %v659_v24, 4  ;;  %v1349_v47 = vrot.slane %v1347_v57, 4  ;;  %v1361_v48 = vrot.slane %v5144_v35, 5  ;;  %v3537_v8 = vrot.slane %v5132_v5, 9 }
  0x70   : > { %v655_v61 = vsel %vm4886_vm3, %v650_v31, %v654_v22  ;;  %v1355_v13 = vsel %vm5093_vm6, %v3536_v49, %v1354_v26  ;;  %v1356_v2 = vrot.slane %v1354_v26, 4  ;;  %v1364_v39 = vrot.slane %v5147_v18, 5 }
  0x71   : > { %v665_v9 = vsel %vm4886_vm3, %v660_v11, %v664_v44  ;;  %v1351_v34 = vsel %vm5093_vm6, %v1349_v47, %v1350_v60  ;;  %v1363_v20 = vrot.slane %v1361_v48, 4  ;;  %v3538_v24 = vrot.slane %v5164_v1, 9 }
  0x72   : > { %v5384_v25 = vcombine.low %v655_v61, %v665_v9  ;;  %v5386_v62 = vcombine.low %v1348_v33, %v1351_v34  ;;  %v1358_v22 = vsel %vm5093_vm6, %v1356_v2, %v1357_v23  ;;  %v1368_v57 = vrot.slane %v5174_v12, 5  ;;  %v4642_v2 = vld [vmem:[%s6066_s1 + $0x48] sm:$0xff]  }
  0x73   : > { %v5390_v38 = vcombine.low %v1355_v13, %v1358_v22  ;;  %v1371_v44 = vrot.slane %v5177_v7, 5  ;;  %v1362_v18 = vsel %vm5093_vm6, %v3537_v8, %v1361_v48  ;;  %v1365_v60 = vsel %vm5093_vm6, %v1363_v20, %v1364_v39 }
  0x74   : > { %3988 = vmatmul.mubr.msk.bf16.gmra.mrb[28].mxu1 %vm747_vm2, %v5384_v25  ;;  %4172 = vmatmul.mubr.msk.bf16.gmra.mrb[12].mxu0 %vm747_vm2, %v5386_v62  ;;  %v1370_v49 = vrot.slane %v1368_v57, 4  ;;  %v1375_v31 = vrot.slane %v5212_v58, 5  ;;  %v1382_v26 = vrot.slane %v5244_v41, 5  ;;  %v1369_v23 = vsel %vm5093_vm6, %v3538_v24, %v1368_v57 }
  0x75   : > { %3999 = vmatprep.mubr.msk.bf16.mxu1 %vm747_vm2, %v3491_v28  ;;  %4175 = vmatprep.mubr.msk.bf16.mxu0 %vm747_vm2, %v5390_v38  ;;  %v5412_v28 = vcombine.low %v1362_v18, %v1365_v60  ;;  %v3539_v11 = vrot.slane %v5204_v45, 9  ;;  %v1378_v47 = vrot.slane %v5221_v0, 5  ;;  %v5418_v48 = vcombine.low %v4899_v42, %v4906_v46 }
  0x76   : > { %v1372_v7 = vsel %vm5093_vm6, %v1370_v49, %v1371_v44  ;;  %v1377_v33 = vrot.slane %v1375_v31, 4  ;;  %v3540_v61 = vrot.slane %v5234_v21, 9  ;;  %v1384_v8 = vrot.slane %v1382_v26, 4 }
  0x77   : > { %v5421_v13 = vcombine.low %v1369_v23, %v1372_v7  ;;  %v1385_v9 = vrot.slane %v5262_v59, 5  ;;  %v1389_v34 = vrot.slane %v5293_v56, 5  ;;  %v1376_v42 = vsel %vm5093_vm6, %v3539_v11, %v1375_v31  ;;  %v5537_v31 = vld [vmem:[%s6066_s1 + $0x60] sm:$0xff]  }
  0x78   : > { %v1379_v46 = vsel %vm5093_vm6, %v1377_v33, %v1378_v47  ;;  %v5441_v0 = vcombine.low %v4917_v53, %v4920_v54  ;;  %v1383_v59 = vsel %vm5093_vm6, %v3540_v61, %v1382_v26  ;;  %v5447_v20 = vcombine.low %v5054_v19, %v5059_v32  ;;  %v4648_v53 = vld [vmem:[%s6066_s1 + $0x50] sm:$0xff]  }
  0x79   : > { %v3541_v39 = vrot.slane %v5275_v17, 9  ;;  %v1396_v22 = vrot.slane %v5323_v3, 5  ;;  %v5460_v54 = vcombine.low %v5087_v4, %v5107_v27  ;;  %v5462_v19 = vcombine.low %v1376_v42, %v1379_v46 }
  0x7a   : > { %v1391_v32 = vrot.slane %v1389_v34, 4  ;;  %v1392_v24 = vrot.slane %v5300_v30, 5  ;;  %v5467_v57 = vcombine.low %v5132_v5, %v5144_v35  ;;  %v5471_v44 = vcombine.low %v5164_v1, %v5174_v12  ;;  %v267_v30 = vld [vmem:[%s4847_s28 + $0xc8] sm:$0x1] }
  0x7b   : > { %v5475_v18 = vcombine.low %v5204_v45, %v5212_v58  ;;  %v5479_v4 = vcombine.low %v5234_v21, %v5244_v41  ;;  %v5483_v27 = vcombine.low %v5275_v17, %v5293_v56  ;;  %v5487_v5 = vcombine.low %v4936_v10, %v4944_v16  ;;  %v5498_v21 = vld [vmem:[%s4847_s28 + $0xc4] sm:$0xf]  ;;  %v4654_v10 = vld [vmem:[%s6066_s1 + $0x58] sm:$0xff]  }
  0x7c   : > { %4000 = vmatmul.mubr.msk.bf16.vlgmr.msra.gmra.mrb[0].mxu1 %vm747_vm2, %v4895_v37  ;;  %4176 = vmatmul.mubr.msk.bf16.gmra.mrb[16].mxu0 %vm747_vm2, %v5412_v28  ;;  %v5493_v1 = vcombine.low %v5312_v43, %v5323_v3  ;;  %v3542_v12 = vrot.slane %v5312_v43, 9  ;;  %v1398_v58 = vrot.slane %v1396_v22, 4  ;;  %v1399_v45 = vrot.slane %v5331_v40, 5  ;;  %v5521_v3 = vld [vmem:[%s4847_s28 + $0xc0] sm:$0xf] }
  0x7d   : > { %4032 = vmatpush3.bf16.msra.mxu1 %v5035_v55  ;;  %4003 = vmatprep.mubr.msk.bf16.mxu1 %vm747_vm2, %v5418_v48  ;;  %v1386_v55 = vsel %vm5093_vm6, %v1384_v8, %v1385_v9  ;;  %v1390_v16 = vsel %vm5093_vm6, %v3541_v39, %v1389_v34  ;;  %v1393_v41 = vsel %vm5093_vm6, %v1391_v32, %v1392_v24  ;;  %v2216_v40 = vrot.slane %v5498_v21, 5 }
  0x7e   : > { %4179 = vmatprep.mubr.msk.bf16.mxu0 %vm747_vm2, %v5421_v13  ;;  %4033 = vmatprep.subr.bf16.mxu1 %v4642_v2  ;;  %v5489_v35 = vcombine.low %v1383_v59, %v1386_v55  ;;  %v1397_v17 = vsel %vm5093_vm6, %v3542_v12, %v1396_v22  ;;  %v1400_v56 = vsel %vm5093_vm6, %v1398_v58, %v1399_v45  ;;  %v1958_v26 = vshrl.u32 %v5521_v3, 16  ;;  %v6126_v22 = vld [vmem:[#allocation7_spill] sm:$0xff]  ;;  %v6127_v45 = vld [vmem:[#allocation20_spill] sm:$0xff] }
  0x7f   : > { %v5526_v43 = vcombine.low %v4959_v36, %v4974_v51  ;;  %v5528_v60 = vcombine.low %v1390_v16, %v1393_v41  ;;  %v5532_v49 = vcombine.low %v4991_v6, %v4999_v15  ;;  %v1961_v23 = vshll.u32 %v5521_v3, 16  ;;  %v4662_v16 = vld [vmem:[%s6066_s1 + $0xf8] sm:$0xff]   ;;  %v4671_v41 = vld [vmem:[%s4847_s28 + $0x4] sm:$0xf] }
  0x80   : > { %v1967_v7 = vshll.u32 %v5498_v21, 16  ;;  %v1971_v36 = vshrl.u32 %v5498_v21, 16  ;;  %v5543_v51 = vcombine.low %v1397_v17, %v1400_v56  ;;  %v3645_v11 = vrot.slane %v5521_v3, 9  ;;  %v4666_v17 = vld [vmem:[%s6066_s1 + $0x100] sm:$0xff]   ;;  %v4672_v56 = vld [vmem:[%s4847_s28 + $0x8] sm:$0x1] }
  0x81   : > { %4034 = vmatpush3.bf16.msra.mxu1 %v4642_v2  ;;  %v2218_v6 = vrot.slane %v2216_v40, 4  ;;  %v2219_v15 = vrot.slane %v267_v30, 5  ;;  %v1960_v33 = vrot.slane %v1958_v26, 4  ;;  %v1963_v47 = vrot.slane %v1961_v23, 5  ;;  %v4673_v26 = vld [vmem:[%s4847_s28] sm:$0xf] }
  0x82   : > { %4035 = vmatprep.subr.bf16.mxu1 %v4648_v53  ;;  %v1969_v61 = vrot.slane %v1967_v7, 5  ;;  %v1973_v2 = vrot.slane %v1971_v36, 4  ;;  %v1977_v34 = vshll.u32 %v267_v30, 16  ;;  %v2217_v42 = vsel %vm5093_vm6, %v3645_v11, %v2216_v40 }
  0x83   : > { %v1964_v8 = vor.u32 %v1963_v47, %v1960_v33  ;;  %v2220_v46 = vsel %vm5093_vm6, %v2218_v6, %v2219_v15  ;;  %v1291_v40 = vrot.slane %v4671_v41, 5  ;;  %v1294_v30 = vrot.slane %v4672_v56, 5  ;;  %v4661_v15 = vld [vmem:[%s6066_s1 + $0x68] sm:$0xff]   ;;  %v6128_v33 = vld [vmem:[#allocation12_spill] sm:$0xff]  ;;  %v6140_v41 = vld [vmem:[#allocation13_spill] sm:$0xff] }
  0x84   : > { %4004 = vmatmul.mubr.msk.bf16.gmra.mrb[4].mxu1 %vm747_vm2, %v5441_v0  ;;  %4180 = vmatmul.mubr.msk.bf16.gmra.mrb[20].mxu0 %vm747_vm2, %v5462_v19  ;;  %v1974_v9 = vor.u32 %v1973_v2, %v1969_v61  ;;  %v1979_v39 = vrot.slane %v1977_v34, 5  ;;  %v5563_v32 = vcombine.low %v2217_v42, %v2220_v46  ;;  %v3527_v23 = vrot.slane %v4673_v26, 9  ;;  %v6129_v47 = vld [vmem:[#allocation14_spill] sm:$0xff]  ;;  %v4667_v2 = vld [vmem:[%s6066_s1 + $0x78] sm:$0xff]   ;;  %v4674_v34 = vld [vmem:[%s6066_s1 + $0x80] sm:$0xff]  }
  0x85   : > { %4007 = vmatprep.mubr.msk.bf16.mxu1 %vm747_vm2, %v5487_v5  ;;  %4183 = vmatprep.mubr.msk.bf16.mxu0 %vm747_vm2, %v5489_v35  ;;  %v1965_v59 = vrot.slane %v1964_v8, 4  ;;  %v1293_v7 = vrot.slane %v1291_v40, 4  ;;  %v6130_v8 = vld [vmem:[#allocation16_spill] sm:$0xff]  ;;  %v6132_v42 = vld [vmem:[#allocation22_spill] sm:$0xff]  ;;  %v6143_v56 = vld [vmem:[#allocation19_spill] sm:$0xff] }
  0x86   : > { %4036 = vmatpush3.bf16.msra.mxu1 %v4648_v53  ;;  %v1975_v55 = vrot.slane %v1974_v9, 4  ;;  %v5561_v53 = vcombine.low %v6126_v22, %v5030_v52  ;;  %v4655_v52 = vld [vmem:[%s6066_s1 + $0xe8] sm:$0xff]   ;;  %v1292_v36 = vsel %vm5093_vm6, %v3527_v23, %v1291_v40  ;;  %v5658_v9 = vcombine.low %v5521_v3, %v5498_v21  ;;  %v6133_v46 = vld [vmem:[#allocation24_spill] sm:$0xff]  ;;  %v5675_v3 = vld [vmem:[%s4847_s28 + $0xd0] sm:$0xf] }
  0x87   : > { %4037 = vmatprep.subr.bf16.mxu1 %v4654_v10  ;;  %v1970_v24 = vsel %vm4886_vm3, %v1965_v59, %v1969_v61  ;;  %v1295_v11 = vsel %vm5093_vm6, %v1293_v7, %v1294_v30  ;;  %v4665_v61 = vld [vmem:[%s6066_s1 + $0x70] sm:$0xff]   ;;  %v5672_v21 = vld [vmem:[%s4847_s28 + $0xcc] sm:$0xf]  ;;  %v2701_v23 = vshrl.u32 %v5675_v3, 16  ;;  %v6144_v7 = vld [vmem:[#allocation21_spill] sm:$0xff]  ;;  %v2946_v29 = vrot.slane %v5675_v3, 5 }
  0x88   : > { %v1980_v12 = vsel %vm4886_vm3, %v1975_v55, %v1979_v39  ;;  %v3551_v6 = vcombine.low %v1292_v36, %v1295_v11  ;;  %v3683_v59 = vcombine.low %v5672_v21, %v5675_v3  ;;  %v6134_v55 = vld [vmem:[#allocation5_spill] sm:$0xff]  ;;  %v4668_v39 = vld [vmem:[%s6066_s1 + $0x108] sm:$0xff]   ;;  %v6141_v40 = vld [vmem:[#allocation15_spill] sm:$0xff]  ;;  %v2688_v30 = vshrl.u32 %v5672_v21, 16 }
  0x89   : > { %v5569_v58 = vcombine.low %v1970_v24, %v1980_v12  ;;  %v6135_v22 = vld [vmem:[#allocation6_spill] sm:$0xff]  ;;  %v6136_v24 = vld [vmem:[#allocation8_spill] sm:$0xff]  ;;  %v4669_v12 = vld [vmem:[%s6066_s1 + $0x110] sm:$0xff]   ;;  %v2691_v26 = vshll.u32 %v5672_v21, 16 }
  0x8a   : > { %4038 = vmatpush3.bf16.msra.mxu1 %v4654_v10  ;;  %v4660_v10 = vld [vmem:[%s6066_s1 + $0xf0] sm:$0xff]   ;;  %v2690_v36 = vrot.slane %v2688_v30, 4 }
  0x8b   : > { %4071 = vmatprep.subr.bf16.mxu1 %v5537_v31  ;;  %v2693_v11 = vrot.slane %v2691_v26, 5 }
  0x8c   : > { %4008 = vmatmul.mubr.msk.bf16.gmra.mrb[8].mxu1 %vm747_vm2, %v5526_v43  ;;  %4184 = vmatmul.mubr.msk.bf16.gmra.mrb[24].mxu0 %vm747_vm2, %v5528_v60 }
  0x8d   : > { %4011 = vmatprep.mubr.msk.bf16.mxu1 %vm747_vm2, %v5532_v49  ;;  %4187 = vmatprep.mubr.msk.bf16.mxu0 %vm747_vm2, %v5543_v51 }
  0x94   : > { %4012 = vmatmul.mubr.msk.bf16.gmra.mrb[12].mxu1 %vm747_vm2, %v5561_v53  ;;  %4188 = vmatmul.mubr.msk.bf16.gmra.mrb[28].mxu0 %vm747_vm2, %v5563_v32 }
  0x95   : > { %4015 = vmatprep.mubr.msk.bf16.mxu1 %vm747_vm2, %v5447_v20  ;;  %4199 = vmatprep.mubr.msk.bf16.mxu0 %vm747_vm2, %v5418_v48 }
  0x9c   : > { %4016 = vmatmul.mubr.msk.bf16.gmra.mrb[16].mxu1 %vm747_vm2, %v5460_v54  ;;  %4200 = vmatmul.mubr.msk.bf16.vlgmr.msra.gmra.mrb[0].mxu0 %vm747_vm2, %v5441_v0 }
  0x9d   : > { %4232 = vmatpush3.bf16.msra.mxu0 %v6127_v45  ;;  %4019 = vmatprep.mubr.msk.bf16.mxu1 %vm747_vm2, %v5467_v57  ;;  %v6137_v45 = vld [vmem:[#allocation9_spill] sm:$0xff] }
  0x9e   : > { %4203 = vmatprep.mubr.msk.bf16.mxu0 %vm747_vm2, %v5487_v5  ;;  %4233 = vmatprep.subr.bf16.mxu0 %v4655_v52 }
  0xa1   : > { %4234 = vmatpush3.bf16.msra.mxu0 %v4655_v52  ;;  %v4670_v52 = vld [vmem:[%s6066_s1 + $0x118] sm:$0xff]  }
  0xa2   : > { %4235 = vmatprep.subr.bf16.mxu0 %v4660_v10 }
  0xa4   : > { %4020 = vmatmul.mubr.msk.bf16.gmra.mrb[20].mxu1 %vm747_vm2, %v5471_v44  ;;  %4204 = vmatmul.mubr.msk.bf16.gmra.mrb[4].mxu0 %vm747_vm2, %v5526_v43 }
  0xa5   : > { %4023 = vmatprep.mubr.msk.bf16.mxu1 %vm747_vm2, %v5475_v18  ;;  %4207 = vmatprep.mubr.msk.bf16.mxu0 %vm747_vm2, %v5532_v49 }
  0xa6   : > { %4236 = vmatpush3.bf16.msra.mxu0 %v4660_v10  ;;  %v6138_v10 = vld [vmem:[#allocation10_spill] sm:$0xff] }
  0xa7   : > { %4237 = vmatprep.subr.bf16.mxu0 %v4662_v16 }
  0xaa   : > { %4238 = vmatpush3.bf16.msra.mxu0 %v4662_v16  ;;  %v6139_v16 = vld [vmem:[#allocation11_spill] sm:$0xff] }
  0xab   : > { %4271 = vmatprep.subr.bf16.mxu0 %v4666_v17 }
  0xac   : > { %4024 = vmatmul.mubr.msk.bf16.gmra.mrb[24].mxu1 %vm747_vm2, %v5479_v4  ;;  %4208 = vmatmul.mubr.msk.bf16.gmra.mrb[8].mxu0 %vm747_vm2, %v5561_v53 }
  0xad   : > { %4027 = vmatprep.mubr.msk.bf16.mxu1 %vm747_vm2, %v5483_v27  ;;  %4211 = vmatprep.mubr.msk.bf16.mxu0 %vm747_vm2, %v5447_v20 }
  0xb4   : > { %4028 = vmatmul.mubr.msk.bf16.gmra.mrb[28].mxu1 %vm747_vm2, %v5493_v1  ;;  %4212 = vmatmul.mubr.msk.bf16.gmra.mrb[12].mxu0 %vm747_vm2, %v5460_v54 }
  0xb5   : > { %4039 = vmatprep.mubr.msk.bf16.mxu1 %vm747_vm2, %v3551_v6  ;;  %4215 = vmatprep.mubr.msk.bf16.mxu0 %vm747_vm2, %v5467_v57 }
  0xbc   : > { %4040 = vmatmul.mubr.msk.bf16.vlgmr.msra.gmra.mrb[0].mxu1 %vm747_vm2, %v6128_v33  ;;  %4216 = vmatmul.mubr.msk.bf16.gmra.mrb[16].mxu0 %vm747_vm2, %v5471_v44  ;;  %v5743_v33 = vld [vmem:[%s4847_s28 + $0xd4] sm:$0x1]  ;;  %s4742_s28 = smov [#allocation2]  }
  0xbd   : > { %4072 = vmatpush3.bf16.msra.mxu1 %v5537_v31  ;;  %4043 = vmatprep.mubr.msk.bf16.mxu1 %vm747_vm2, %v6129_v47  ;;  %v6131_v31 = vld [vmem:[#allocation18_spill] sm:$0xff]  ;;  %s4682_s8 = sshll.u32 %s4742_s28, 4  ;;  %s4683_s8 = int_to_ptr.vmem [resolvable:$false] %s4682_s8 }
  0xbe   : > { %4219 = vmatprep.mubr.msk.bf16.mxu0 %vm747_vm2, %v5475_v18  ;;  %4073 = vmatprep.subr.bf16.mxu1 %v4661_v15  ;;  %s4684_s9 = scalar_lea.vmem %s4683_s8, 8192  ;;  %p4685_p0 = scmp.lt.s32.totalorder %s6014_s27, %s4683_s8 }
  0xbf   : > { %p4686_p1 = scmp.lt.s32.totalorder %s4684_s9, %s4678_s6 }
  0xc1   : > { %4074 = vmatpush3.bf16.msra.mxu1 %v4661_v15  ;;  %v2703_v15 = vrot.slane %v2701_v23, 4  ;;  %v3255_v23 = vld [vmem:[%s5871_s20 + $0x8] sm:$0xff]  ;;  %p4687_p2 = por %p4686_p1, %p4685_p0 }
  0xc2   : > { %4075 = vmatprep.subr.bf16.mxu1 %v4665_v61 }
  0xc3   : > { %p4688_p3 = pnand %p4687_p2, %p4681_p13 }
  0xc4   : > { %4044 = vmatmul.mubr.msk.bf16.gmra.mrb[4].mxu1 %vm747_vm2, %v6130_v8  ;;  %4220 = vmatmul.mubr.msk.bf16.gmra.mrb[20].mxu0 %vm747_vm2, %v5479_v4 }
  0xc5   : > { %4047 = vmatprep.mubr.msk.bf16.mxu1 %vm747_vm2, %v6131_v31  ;;  %4223 = vmatprep.mubr.msk.bf16.mxu0 %vm747_vm2, %v5483_v27 }
  0xc6   : > { %4076 = vmatpush3.bf16.msra.mxu1 %v4665_v61  ;;  %v6145_v61 = vld [vmem:[#allocation23_spill] sm:$0xff] }
  0xc7   : > { %4077 = vmatprep.subr.bf16.mxu1 %v4667_v2 }
  0xca   : > { %4078 = vmatpush3.bf16.msra.mxu1 %v4667_v2  ;;  %v2694_v2 = vor.u32 %v2693_v11, %v2690_v36 }
  0xcb   : > { %4311 = vmatprep.subr.bf16.mxu1 %v4674_v34 }
  0xcc   : > { %4048 = vmatmul.mubr.msk.bf16.gmra.mrb[8].mxu1 %vm747_vm2, %v6132_v42  ;;  %4224 = vmatmul.mubr.msk.bf16.gmra.mrb[24].mxu0 %vm747_vm2, %v5493_v1 }
  0xcd   : > { %4051 = vmatprep.mubr.msk.bf16.mxu1 %vm747_vm2, %v6133_v46  ;;  %4227 = vmatprep.mubr.msk.bf16.mxu0 %vm747_vm2, %v5658_v9 }
  0xd4   : > { %4052 = vmatmul.mubr.msk.bf16.gmra.mrb[12].mxu1 %vm747_vm2, %v5355_v50  ;;  %4228 = vmatmul.mubr.msk.bf16.gmra.mrb[28].mxu0 %vm747_vm2, %v3683_v59  ;;  %v2707_v59 = vshll.u32 %v5743_v33, 16 }
  0xd5   : > { %4055 = vmatprep.mubr.msk.bf16.mxu1 %vm747_vm2, %v5386_v62  ;;  %4239 = vmatprep.mubr.msk.bf16.mxu0 %vm747_vm2, %v6134_v55  ;;  %v4677_v55 = vld [vmem:[%s6066_s1 + $0x98] sm:$0xff]  }
  0xdc   : > { %4056 = vmatmul.mubr.msk.bf16.gmra.mrb[16].mxu1 %vm747_vm2, %v5390_v38  ;;  %4240 = vmatmul.mubr.msk.bf16.vlgmr.msra.gmra.mrb[0].mxu0 %vm747_vm2, %v6135_v22  ;;  %v2709_v22 = vrot.slane %v2707_v59, 5  ;;  %v3260_v59 = vld [vmem:[%s5871_s20 + $0x30] sm:$0xff] }
  0xdd   : > { %4272 = vmatpush3.bf16.msra.mxu0 %v4666_v17  ;;  %4059 = vmatprep.mubr.msk.bf16.mxu1 %vm747_vm2, %v5412_v28  ;;  %v6142_v17 = vld [vmem:[#allocation17_spill] sm:$0xff] }
  0xde   : > { %4243 = vmatprep.mubr.msk.bf16.mxu0 %vm747_vm2, %v6136_v24  ;;  %4273 = vmatprep.subr.bf16.mxu0 %v4668_v39 }
  0xe1   : > { %4274 = vmatpush3.bf16.msra.mxu0 %v4668_v39 }
  0xe2   : > { %4275 = vmatprep.subr.bf16.mxu0 %v4669_v12 }
  0xe4   : > { %4060 = vmatmul.mubr.msk.bf16.gmra.mrb[20].mxu1 %vm747_vm2, %v5421_v13  ;;  %4244 = vmatmul.mubr.msk.bf16.gmra.mrb[4].mxu0 %vm747_vm2, %v6137_v45 }
  0xe5   : > { %4063 = vmatprep.mubr.msk.bf16.mxu1 %vm747_vm2, %v5462_v19  ;;  %4247 = vmatprep.mubr.msk.bf16.mxu0 %vm747_vm2, %v6138_v10 }
  0xe6   : > { %4276 = vmatpush3.bf16.msra.mxu0 %v4669_v12 }
  0xe7   : > { %4277 = vmatprep.subr.bf16.mxu0 %v4670_v52 }
  0xea   : > { %4278 = vmatpush3.bf16.msra.mxu0 %v4670_v52 }
  0xec   : > { %4064 = vmatmul.mubr.msk.bf16.gmra.mrb[24].mxu1 %vm747_vm2, %v5489_v35  ;;  %4248 = vmatmul.mubr.msk.bf16.gmra.mrb[8].mxu0 %vm747_vm2, %v6139_v16  ;;  %v3254_v16 = vld [vmem:[%s5871_s20] sm:$0xff] }
  0xed   : > { %4067 = vmatprep.mubr.msk.bf16.mxu1 %vm747_vm2, %v5528_v60  ;;  %4251 = vmatprep.mubr.msk.bf16.mxu0 %vm747_vm2, %v6140_v41 }
  0xf4   : > { %4068 = vmatmul.mubr.msk.bf16.gmra.mrb[28].mxu1 %vm747_vm2, %v5543_v51  ;;  %4252 = vmatmul.mubr.msk.bf16.gmra.mrb[12].mxu0 %vm747_vm2, %v6141_v40 }
  0xf5   : > { %4079 = vmatprep.mubr.msk.bf16.mxu1 %vm747_vm2, %v4895_v37  ;;  %4255 = vmatprep.mubr.msk.bf16.mxu0 %vm747_vm2, %v6142_v17  ;;  %v2697_v37 = vshll.u32 %v5675_v3, 16  ;;  %v3256_v3 = vld [vmem:[%s5871_s20 + $0x10] sm:$0xff] }
  0xf7   : > { %v2699_v6 = vrot.slane %v2697_v37, 5 }
  0xfc   : > { %4080 = vmatmul.mubr.msk.bf16.vlgmr.msra.gmra.mrb[0].mxu1 %vm747_vm2, %v5418_v48  ;;  %4256 = vmatmul.mubr.msk.bf16.gmra.mrb[16].mxu0 %vm747_vm2, %v6143_v56  ;;  %v4675_v48 = vld [vmem:[%s6066_s1 + $0x88] sm:$0xff]  }
  0xfd   : > { %4315 = vmatpush3.bf16.msra.mxu1 %v4674_v34  ;;  %4083 = vmatprep.mubr.msk.bf16.mxu1 %vm747_vm2, %v5441_v0  ;;  %v4676_v0 = vld [vmem:[%s6066_s1 + $0x90] sm:$0xff]   ;;  %v2704_v34 = vor.u32 %v2703_v15, %v2699_v6 }
  0xfe   : > { %4259 = vmatprep.mubr.msk.bf16.mxu0 %vm747_vm2, %v6144_v7  ;;  %4312 = vmatprep.subr.bf16.mxu1 %v4675_v48 }
  0xff   : > { %v2705_v39 = vrot.slane %v2704_v34, 4 }
 0x101   : > { %4316 = vmatpush3.bf16.msra.mxu1 %v4675_v48  ;;  %v2710_v24 = vsel %vm4886_vm3, %v2705_v39, %v2709_v22  ;;  %v3258_v22 = vld [vmem:[%s5871_s20 + $0x20] sm:$0xff] }
 0x102   : > { %4313 = vmatprep.subr.bf16.mxu1 %v4676_v0 }
 0x104   : > { %4084 = vmatmul.mubr.msk.bf16.gmra.mrb[4].mxu1 %vm747_vm2, %v5487_v5  ;;  %4260 = vmatmul.mubr.msk.bf16.gmra.mrb[20].mxu0 %vm747_vm2, %v6145_v61  ;;  %v2695_v5 = vrot.slane %v2694_v2, 4 }
 0x105   : > { %4087 = vmatprep.mubr.msk.bf16.mxu1 %vm747_vm2, %v5526_v43  ;;  %4263 = vmatprep.mubr.msk.bf16.mxu0 %vm747_vm2, %v5357_v63 }
 0x106   : > { %4317 = vmatpush3.bf16.msra.mxu1 %v4676_v0  ;;  %v2700_v43 = vsel %vm4886_vm3, %v2695_v5, %v2699_v6 }
 0x107   : > { %4314 = vmatprep.subr.bf16.mxu1 %v4677_v55  ;;  %v3712_v12 = vcombine.low %v2700_v43, %v2710_v24 }
 0x10a   : > { %4318 = vmatpush3.bf16.msra.mxu1 %v4677_v55 }
 0x10c   : > { %4088 = vmatmul.mubr.msk.bf16.gmra.mrb[8].mxu1 %vm747_vm2, %v5532_v49  ;;  %4264 = vmatmul.mubr.msk.bf16.gmra.mrb[24].mxu0 %vm747_vm2, %v5384_v25 }
 0x10d   : > { %4091 = vmatprep.mubr.msk.bf16.mxu1 %vm747_vm2, %v5561_v53  ;;  %4267 = vmatprep.mubr.msk.bf16.mxu0 %vm747_vm2, %v5569_v58 }
 0x114   : > { %4092 = vmatmul.mubr.msk.bf16.gmra.mrb[12].mxu1 %vm747_vm2, %v5447_v20  ;;  %4268 = vmatmul.mubr.msk.bf16.gmra.mrb[28].mxu0 %vm747_vm2, %v3712_v12  ;;  %v3261_v12 = vld [vmem:[%s5871_s20 + $0x38] sm:$0xff] }
 0x115   : > { %4095 = vmatprep.mubr.msk.bf16.mxu1 %vm747_vm2, %v5460_v54  ;;  %4279 = vmatprep.mubr.msk.bf16.mxu0 %vm747_vm2, %v6129_v47 }
 0x11c   : > { %4096 = vmatmul.mubr.msk.bf16.gmra.mrb[16].mxu1 %vm747_vm2, %v5467_v57  ;;  %4280 = vmatmul.mubr.msk.bf16.vlgmr.msra.gmra.mrb[0].mxu0 %vm747_vm2, %v6130_v8 }
 0x11d   : > { %4099 = vmatprep.mubr.msk.bf16.mxu1 %vm747_vm2, %v5471_v44  ;;  %4283 = vmatprep.mubr.msk.bf16.mxu0 %vm747_vm2, %v6131_v31 }
 0x124   : > { %4100 = vmatmul.mubr.msk.bf16.gmra.mrb[20].mxu1 %vm747_vm2, %v5475_v18  ;;  %4284 = vmatmul.mubr.msk.bf16.gmra.mrb[4].mxu0 %vm747_vm2, %v6132_v42 }
 0x125   : > { %4103 = vmatprep.mubr.msk.bf16.mxu1 %vm747_vm2, %v5479_v4  ;;  %4287 = vmatprep.mubr.msk.bf16.mxu0 %vm747_vm2, %v6133_v46 }
 0x12c   : > { %4104 = vmatmul.mubr.msk.bf16.gmra.mrb[24].mxu1 %vm747_vm2, %v5483_v27  ;;  %4288 = vmatmul.mubr.msk.bf16.gmra.mrb[8].mxu0 %vm747_vm2, %v5355_v50  ;;  %v3733_v50 = vrot.slane %v5672_v21, 9 }
 0x12d   : > { %4107 = vmatprep.mubr.msk.bf16.mxu1 %vm747_vm2, %v5493_v1  ;;  %4291 = vmatprep.mubr.msk.bf16.mxu0 %vm747_vm2, %v5386_v62  ;;  %v2948_v62 = vrot.slane %v2946_v29, 4 }
 0x134   : > { %4108 = vmatmul.mubr.msk.bf16.gmra.mrb[28].mxu1 %vm747_vm2, %v5658_v9  ;;  %4292 = vmatmul.mubr.msk.bf16.gmra.mrb[12].mxu0 %vm747_vm2, %v5390_v38  ;;  %v2949_v38 = vrot.slane %v5743_v33, 5 }
 0x135   : > { %4135 = vmatprep.mubr.msk.bf16.mxu1 %vm747_vm2, %v6141_v40  ;;  %4295 = vmatprep.mubr.msk.bf16.mxu0 %vm747_vm2, %v5412_v28  ;;  %v2947_v28 = vsel %vm5093_vm6, %v3733_v50, %v2946_v29 }
 0x13c   : > { %4136 = vmatmul.mubr.msk.bf16.vlgmr.msra.gmra.mrb[16].mxu1 %vm747_vm2, %v6142_v17  ;;  %4296 = vmatmul.mubr.msk.bf16.gmra.mrb[16].mxu0 %vm747_vm2, %v5421_v13  ;;  %v2950_v13 = vsel %vm5093_vm6, %v2948_v62, %v2949_v38  ;;  %v3257_v17 = vld [vmem:[%s5871_s20 + $0x18] sm:$0xff]  ;;  %v3259_v38 = vld [vmem:[%s5871_s20 + $0x28] sm:$0xff] }
 0x13d   : > { %4139 = vmatprep.mubr.msk.bf16.mxu1 %vm747_vm2, %v6143_v56  ;;  %4299 = vmatprep.mubr.msk.bf16.mxu0 %vm747_vm2, %v5462_v19  ;;  %v3742_v20 = vcombine.low %v2947_v28, %v2950_v13 }
 0x144   : > { %4140 = vmatmul.mubr.msk.bf16.gmra.mrb[20].mxu1 %vm747_vm2, %v6144_v7  ;;  %4300 = vmatmul.mubr.msk.bf16.gmra.mrb[20].mxu0 %vm747_vm2, %v5489_v35 }
 0x145   : > { %4143 = vmatprep.mubr.msk.bf16.mxu1 %vm747_vm2, %v6145_v61  ;;  %4303 = vmatprep.mubr.msk.bf16.mxu0 %vm747_vm2, %v5528_v60 }
 0x14c   : > { %4144 = vmatmul.mubr.msk.bf16.gmra.mrb[24].mxu1 %vm747_vm2, %v5357_v63  ;;  %4304 = vmatmul.mubr.msk.bf16.gmra.mrb[24].mxu0 %vm747_vm2, %v5543_v51 }
 0x14d   : > { %4147 = vmatprep.mubr.msk.bf16.mxu1 %vm747_vm2, %v5384_v25  ;;  %4307 = vmatprep.mubr.msk.bf16.mxu0 %vm747_vm2, %v5563_v32 }
 0x154   : > { %4148 = vmatmul.mubr.msk.bf16.gmra.mrb[28].mxu1 %vm747_vm2, %v5569_v58  ;;  %4308 = vmatmul.mubr.msk.bf16.gmra.mrb[28].mxu0 %vm747_vm2, %v3742_v20  ;;  %v5866_v58 = vld [vmem:[%s6067_s2] ss:$0 sm:$0xff] }
 0x1cf   : > { %v4081_v63 = vpop.f32.mrb[0].mxu1 }
 0x1d0   : > { %v1798_v54 = vpop.f32.mrb[1].mxu1 }
 0x1d1   : > { %v4082_v25 = vpop.f32.mrb[2].mxu1 }
 0x1d2   : > { %v1801_v19 = vpop.f32.mrb[3].mxu1 }
 0x1d7   : > { %v4085_v57 = vpop.f32.mrb[4].mxu1 }
 0x1d8   : > { %v1814_v44 = vpop.f32.mrb[5].mxu1 }
 0x1d9   : > { %v4086_v18 = vpop.f32.mrb[6].mxu1 }
 0x1da   : > { %v1817_v4 = vpop.f32.mrb[7].mxu1 }
 0x1df   : > { %v5845_v27 = vpop.f32.mrb[8].mxu1 }
 0x1e0   : > { %v5847_v14 = vpop.f32.mrb[9].mxu1 }
 0x1e1   : > { %v5849_v35 = vpop.f32.mrb[10].mxu1 }
 0x1e2   : > { %v5851_v1 = vpop.f32.mrb[11].mxu1 }
 0x1e7   : > { %v5853_v60 = vpop.f32.mrb[12].mxu1 }
 0x1e8   : > { %v5855_v49 = vpop.f32.mrb[13].mxu1 }
 0x1e9   : > { %v5857_v51 = vpop.f32.mrb[14].mxu1 }
 0x1ea   : > { %v5859_v53 = vpop.f32.mrb[15].mxu1 }
 0x1ef   : > { %v4281_v32 = vpop.f32.mrb[0].mxu0 }
 0x1f0   : > { %v4319_v47 = vadd.f32 %v4281_v32, %v4081_v63  ;;  %v3024_v8 = vpop.f32.mrb[1].mxu0 }
 0x1f1   : > { %v4320_v31 = vadd.f32 %v3024_v8, %v1798_v54  ;;  %v4282_v9 = vpop.f32.mrb[2].mxu0 }
 0x1f2   : > { %v3192_v42 = vadd.f32 %v4319_v47, %v5866_v58  ;;  %v4321_v46 = vadd.f32 %v4282_v9, %v4082_v25  ;;  %v3027_v21 = vpop.f32.mrb[3].mxu0 }
 0x1f3   : > { %v3190_v52 = vadd.f32 %v4320_v31, %v5866_v58  ;;  %v4322_v45 = vadd.f32 %v3027_v21, %v1801_v19 }
 0x1f4   : > { %v3224_v10 = vmax.f32 %v3192_v42, 0.0  ;;  %v3193_v41 = vadd.f32 %v4321_v46, %v5866_v58  ;;  %v3265_v46 = vld [vmem:[%s5871_s20 + $0x58] sm:$0xff] }
 0x1f5   : > { %v3222_v40 = vmax.f32 %v3190_v52, 0.0  ;;  %v3191_v56 = vadd.f32 %v4322_v45, %v5866_v58  ;;  %v3263_v52 = vld [vmem:[%s5871_s20 + $0x48] sm:$0xff] }
 0x1f6   : > { %v3288_v30 = vadd.f32 %v3256_v3, %v3224_v10  ;;  %v3225_v26 = vmax.f32 %v3193_v41, 0.0 }
 0x1f7   : > { %v3286_v37 = vadd.f32 %v3254_v16, %v3222_v40  ;;  %v3223_v7 = vmax.f32 %v3191_v56, 0.0  ;;  %v4285_v48 = vpop.f32.mrb[4].mxu0 }
 0x1f8   : > { %3321 = vst.msk [vmem:[%s5883_s22 + $0x10] sm:$0xff] %vm3318_vm7, %v3288_v30  ;;  %v3289_v36 = vadd.f32 %v3257_v17, %v3225_v26  ;;  %v4323_v11 = vadd.f32 %v4285_v48, %v4085_v57  ;;  %v3040_v6 = vpop.f32.mrb[5].mxu0 }
 0x1f9   : > { %3319 = vst.msk [vmem:[%s5883_s22] sm:$0xff] %vm3318_vm7, %v3286_v37  ;;  %v3287_v15 = vadd.f32 %v3255_v23, %v3223_v7  ;;  %v4324_v33 = vadd.f32 %v3040_v6, %v1814_v44  ;;  %v4286_v0 = vpop.f32.mrb[6].mxu0  ;;  %v3268_v7 = vld [vmem:[%s5871_s20 + $0x70] sm:$0xff] }
 0x1fa   : > { %3322 = vst.msk [vmem:[%s5883_s22 + $0x18] sm:$0xff] %vm3318_vm7, %v3289_v36  ;;  %v3196_v61 = vadd.f32 %v4323_v11, %v5866_v58  ;;  %v4325_v2 = vadd.f32 %v4286_v0, %v4086_v18  ;;  %v3043_v34 = vpop.f32.mrb[7].mxu0  ;;  %v3266_v11 = vld [vmem:[%s5871_s20 + $0x60] sm:$0xff] }
 0x1fb   : > { %3320 = vst.msk [vmem:[%s5883_s22 + $0x8] sm:$0xff] %vm3318_vm7, %v3287_v15  ;;  %v3194_v55 = vadd.f32 %v4324_v33, %v5866_v58  ;;  %v4326_v5 = vadd.f32 %v3043_v34, %v1817_v4  ;;  %v3269_v15 = vld [vmem:[%s5871_s20 + $0x78] sm:$0xff] }
 0x1fc   : > { %v3228_v39 = vmax.f32 %v3196_v61, 0.0  ;;  %v3197_v43 = vadd.f32 %v4325_v2, %v5866_v58  ;;  %v3267_v61 = vld [vmem:[%s5871_s20 + $0x68] sm:$0xff] }
 0x1fd   : > { %v3226_v24 = vmax.f32 %v3194_v55, 0.0  ;;  %v3195_v29 = vadd.f32 %v4326_v5, %v5866_v58 }
 0x1fe   : > { %v3292_v50 = vadd.f32 %v3260_v59, %v3228_v39  ;;  %v3229_v62 = vmax.f32 %v3197_v43, 0.0 }
 0x1ff   : > { %v3290_v28 = vadd.f32 %v3258_v22, %v3226_v24  ;;  %v3227_v13 = vmax.f32 %v3195_v29, 0.0  ;;  %v4289_v20 = vpop.f32.mrb[8].mxu0 }
 0x200   : > { %3325 = vst.msk [vmem:[%s5883_s22 + $0x30] sm:$0xff] %vm3318_vm7, %v3292_v50  ;;  %v3293_v63 = vadd.f32 %v3261_v12, %v3229_v62  ;;  %v4327_v54 = vadd.f32 %v4289_v20, %v5845_v27  ;;  %v3056_v25 = vpop.f32.mrb[9].mxu0  ;;  %v3264_v27 = vld [vmem:[%s5871_s20 + $0x50] sm:$0xff] }
 0x201   : > { %3323 = vst.msk [vmem:[%s5883_s22 + $0x20] sm:$0xff] %vm3318_vm7, %v3290_v28  ;;  %v3291_v19 = vadd.f32 %v3259_v38, %v3227_v13  ;;  %v4328_v57 = vadd.f32 %v3056_v25, %v5847_v14  ;;  %v4290_v44 = vpop.f32.mrb[10].mxu0  ;;  %v3262_v14 = vld [vmem:[%s5871_s20 + $0x40] sm:$0xff]  ;;  %v3272_v13 = vld [vmem:[%s5871_s20 + $0x90] sm:$0xff] }
 0x202   : > { %3326 = vst.msk [vmem:[%s5883_s22 + $0x38] sm:$0xff] %vm3318_vm7, %v3293_v63  ;;  %v3200_v18 = vadd.f32 %v4327_v54, %v5866_v58  ;;  %v4329_v4 = vadd.f32 %v4290_v44, %v5849_v35  ;;  %v3059_v32 = vpop.f32.mrb[11].mxu0  ;;  %v3270_v25 = vld [vmem:[%s5871_s20 + $0x80] sm:$0xff]  ;;  %v3273_v44 = vld [vmem:[%s5871_s20 + $0x98] sm:$0xff] }
 0x203   : > { %3324 = vst.msk [vmem:[%s5883_s22 + $0x28] sm:$0xff] %vm3318_vm7, %v3291_v19  ;;  %v3198_v47 = vadd.f32 %v4328_v57, %v5866_v58  ;;  %v4330_v8 = vadd.f32 %v3059_v32, %v5851_v1 }
 0x204   : > { %v3232_v31 = vmax.f32 %v3200_v18, 0.0  ;;  %v3201_v9 = vadd.f32 %v4329_v4, %v5866_v58 }
 0x205   : > { %v3230_v42 = vmax.f32 %v3198_v47, 0.0  ;;  %v3199_v21 = vadd.f32 %v4330_v8, %v5866_v58 }
 0x206   : > { %v3296_v35 = vadd.f32 %v3264_v27, %v3232_v31  ;;  %v3233_v3 = vmax.f32 %v3201_v9, 0.0  ;;  %v3271_v27 = vld [vmem:[%s5871_s20 + $0x88] sm:$0xff] }
 0x207   : > { %v3294_v45 = vadd.f32 %v3262_v14, %v3230_v42  ;;  %v3231_v10 = vmax.f32 %v3199_v21, 0.0  ;;  %v4293_v16 = vpop.f32.mrb[12].mxu0 }
 0x208   : > { %3329 = vst.msk [vmem:[%s5883_s22 + $0x50] sm:$0xff] %vm3318_vm7, %v3296_v35  ;;  %v3297_v1 = vadd.f32 %v3265_v46, %v3233_v3  ;;  %v4331_v41 = vadd.f32 %v4293_v16, %v5853_v60  ;;  %v3072_v40 = vpop.f32.mrb[13].mxu0 }
 0x209   : > { %3327 = vst.msk [vmem:[%s5883_s22 + $0x40] sm:$0xff] %vm3318_vm7, %v3294_v45  ;;  %v3295_v17 = vadd.f32 %v3263_v52, %v3231_v10  ;;  %v4332_v56 = vadd.f32 %v3072_v40, %v5855_v49  ;;  %v4294_v30 = vpop.f32.mrb[14].mxu0  ;;  %v3276_v40 = vld [vmem:[%s5871_s20 + $0xb0] sm:$0xff] }
 0x20a   : > { %3330 = vst.msk [vmem:[%s5883_s22 + $0x58] sm:$0xff] %vm3318_vm7, %v3297_v1  ;;  %v3204_v26 = vadd.f32 %v4331_v41, %v5866_v58  ;;  %v4333_v23 = vadd.f32 %v4294_v30, %v5857_v51  ;;  %v3075_v37 = vpop.f32.mrb[15].mxu0 }
 0x20b   : > { %3328 = vst.msk [vmem:[%s5883_s22 + $0x48] sm:$0xff] %vm3318_vm7, %v3295_v17  ;;  %v3202_v60 = vadd.f32 %v4332_v56, %v5866_v58  ;;  %v4334_v48 = vadd.f32 %v3075_v37, %v5859_v53 }
 0x20c   : > { %v3236_v36 = vmax.f32 %v3204_v26, 0.0  ;;  %v3205_v49 = vadd.f32 %v4333_v23, %v5866_v58  ;;  %v3274_v26 = vld [vmem:[%s5871_s20 + $0xa0] sm:$0xff] }
 0x20d   : > { %v3234_v6 = vmax.f32 %v3202_v60, 0.0  ;;  %v3203_v33 = vadd.f32 %v4334_v48, %v5866_v58 }
 0x20e   : > { %v3300_v0 = vadd.f32 %v3268_v7, %v3236_v36  ;;  %v3237_v51 = vmax.f32 %v3205_v49, 0.0  ;;  %v3277_v7 = vld [vmem:[%s5871_s20 + $0xb8] sm:$0xff] }
 0x20f   : > { %v3298_v2 = vadd.f32 %v3266_v11, %v3234_v6  ;;  %v3235_v34 = vmax.f32 %v3203_v33, 0.0  ;;  %v4137_v59 = vpop.f32.mrb[16].mxu1  ;;  %v4297_v55 = vpop.f32.mrb[16].mxu0  ;;  %v3275_v11 = vld [vmem:[%s5871_s20 + $0xa8] sm:$0xff] }
 0x210   : > { %3333 = vst.msk [vmem:[%s5883_s22 + $0x70] sm:$0xff] %vm3318_vm7, %v3300_v0  ;;  %v3301_v53 = vadd.f32 %v3269_v15, %v3237_v51  ;;  %v4335_v5 = vadd.f32 %v4297_v55, %v4137_v59  ;;  %v2118_v39 = vpop.f32.mrb[17].mxu1  ;;  %v3088_v22 = vpop.f32.mrb[17].mxu0 }
 0x211   : > { %3331 = vst.msk [vmem:[%s5883_s22 + $0x60] sm:$0xff] %vm3318_vm7, %v3298_v2  ;;  %v3299_v43 = vadd.f32 %v3267_v61, %v3235_v34  ;;  %v4336_v24 = vadd.f32 %v3088_v22, %v2118_v39  ;;  %v4138_v12 = vpop.f32.mrb[18].mxu1  ;;  %v4298_v29 = vpop.f32.mrb[18].mxu0 }
 0x212   : > { %3334 = vst.msk [vmem:[%s5883_s22 + $0x78] sm:$0xff] %vm3318_vm7, %v3301_v53  ;;  %v3208_v50 = vadd.f32 %v4335_v5, %v5866_v58  ;;  %v4337_v62 = vadd.f32 %v4298_v29, %v4138_v12  ;;  %v2121_v38 = vpop.f32.mrb[19].mxu1  ;;  %v3091_v28 = vpop.f32.mrb[19].mxu0 }
 0x213   : > { %3332 = vst.msk [vmem:[%s5883_s22 + $0x68] sm:$0xff] %vm3318_vm7, %v3299_v43  ;;  %v3206_v20 = vadd.f32 %v4336_v24, %v5866_v58  ;;  %v4338_v63 = vadd.f32 %v3091_v28, %v2121_v38  ;;  %v3280_v24 = vld [vmem:[%s5871_s20 + $0xd0] sm:$0xff] }
 0x214   : > { %v3240_v54 = vmax.f32 %v3208_v50, 0.0  ;;  %v3209_v19 = vadd.f32 %v4337_v62, %v5866_v58  ;;  %v3278_v62 = vld [vmem:[%s5871_s20 + $0xc0] sm:$0xff] }
 0x215   : > { %v3238_v57 = vmax.f32 %v3206_v20, 0.0  ;;  %v3207_v18 = vadd.f32 %v4338_v63, %v5866_v58 }
 0x216   : > { %v3304_v4 = vadd.f32 %v3272_v13, %v3240_v54  ;;  %v3241_v32 = vmax.f32 %v3209_v19, 0.0  ;;  %v3281_v13 = vld [vmem:[%s5871_s20 + $0xd8] sm:$0xff] }
 0x217   : > { %v3302_v47 = vadd.f32 %v3270_v25, %v3238_v57  ;;  %v3239_v8 = vmax.f32 %v3207_v18, 0.0  ;;  %v4141_v31 = vpop.f32.mrb[20].mxu1  ;;  %v4301_v14 = vpop.f32.mrb[20].mxu0  ;;  %v3279_v25 = vld [vmem:[%s5871_s20 + $0xc8] sm:$0xff] }
 0x218   : > { %3337 = vst.msk [vmem:[%s5883_s22 + $0x90] sm:$0xff] %vm3318_vm7, %v3304_v4  ;;  %v3305_v9 = vadd.f32 %v3273_v44, %v3241_v32  ;;  %v4339_v42 = vadd.f32 %v4301_v14, %v4141_v31  ;;  %v2134_v46 = vpop.f32.mrb[21].mxu1  ;;  %v3104_v21 = vpop.f32.mrb[21].mxu0 }
 0x219   : > { %3335 = vst.msk [vmem:[%s5883_s22 + $0x80] sm:$0xff] %vm3318_vm7, %v3302_v47  ;;  %v3303_v35 = vadd.f32 %v3271_v27, %v3239_v8  ;;  %v4340_v3 = vadd.f32 %v3104_v21, %v2134_v46  ;;  %v4142_v52 = vpop.f32.mrb[22].mxu1  ;;  %v4302_v45 = vpop.f32.mrb[22].mxu0 }
 0x21a   : > { %3338 = vst.msk [vmem:[%s5883_s22 + $0x98] sm:$0xff] %vm3318_vm7, %v3305_v9  ;;  %v3212_v10 = vadd.f32 %v4339_v42, %v5866_v58  ;;  %v4341_v16 = vadd.f32 %v4302_v45, %v4142_v52  ;;  %v2137_v1 = vpop.f32.mrb[23].mxu1  ;;  %v3107_v41 = vpop.f32.mrb[23].mxu0 }
 0x21b   : > { %3336 = vst.msk [vmem:[%s5883_s22 + $0x88] sm:$0xff] %vm3318_vm7, %v3303_v35  ;;  %v3210_v17 = vadd.f32 %v4340_v3, %v5866_v58  ;;  %v4342_v56 = vadd.f32 %v3107_v41, %v2137_v1  ;;  %v3284_v3 = vld [vmem:[%s5871_s20 + $0xf0] sm:$0xff] }
 0x21c   : > { %v3244_v30 = vmax.f32 %v3212_v10, 0.0  ;;  %v3213_v23 = vadd.f32 %v4341_v16, %v5866_v58  ;;  %v3282_v16 = vld [vmem:[%s5871_s20 + $0xe0] sm:$0xff] }
 0x21d   : > { %v3242_v37 = vmax.f32 %v3210_v17, 0.0  ;;  %v3211_v60 = vadd.f32 %v4342_v56, %v5866_v58 }
 0x21e   : > { %v3308_v48 = vadd.f32 %v3276_v40, %v3244_v30  ;;  %v3245_v36 = vmax.f32 %v3213_v23, 0.0  ;;  %v3285_v40 = vld [vmem:[%s5871_s20 + $0xf8] sm:$0xff] }
 0x21f   : > { %v3306_v49 = vadd.f32 %v3274_v26, %v3242_v37  ;;  %v3243_v6 = vmax.f32 %v3211_v60, 0.0  ;;  %v4145_v15 = vpop.f32.mrb[24].mxu1  ;;  %v4305_v33 = vpop.f32.mrb[24].mxu0  ;;  %v3283_v26 = vld [vmem:[%s5871_s20 + $0xe8] sm:$0xff] }
 0x220   : > { %3341 = vst.msk [vmem:[%s5883_s22 + $0xb0] sm:$0xff] %vm3318_vm7, %v3308_v48  ;;  %v3309_v0 = vadd.f32 %v3277_v7, %v3245_v36  ;;  %v4343_v51 = vadd.f32 %v4305_v33, %v4145_v15  ;;  %v2150_v61 = vpop.f32.mrb[25].mxu1  ;;  %v3120_v2 = vpop.f32.mrb[25].mxu0 }
 0x221   : > { %3339 = vst.msk [vmem:[%s5883_s22 + $0xa0] sm:$0xff] %vm3318_vm7, %v3306_v49  ;;  %v3307_v34 = vadd.f32 %v3275_v11, %v3243_v6  ;;  %v4344_v59 = vadd.f32 %v3120_v2, %v2150_v61  ;;  %v4146_v55 = vpop.f32.mrb[26].mxu1  ;;  %v4306_v53 = vpop.f32.mrb[26].mxu0 }
 0x222   : > { %3342 = vst.msk [vmem:[%s5883_s22 + $0xb8] sm:$0xff] %vm3318_vm7, %v3309_v0  ;;  %v3216_v5 = vadd.f32 %v4343_v51, %v5866_v58  ;;  %v4345_v39 = vadd.f32 %v4306_v53, %v4146_v55  ;;  %v2153_v22 = vpop.f32.mrb[27].mxu1  ;;  %v3123_v43 = vpop.f32.mrb[27].mxu0 }
 0x223   : > { %3340 = vst.msk [vmem:[%s5883_s22 + $0xa8] sm:$0xff] %vm3318_vm7, %v3307_v34  ;;  %v3214_v12 = vadd.f32 %v4344_v59, %v5866_v58  ;;  %v4346_v29 = vadd.f32 %v3123_v43, %v2153_v22 }
 0x224   : > { %v3248_v50 = vmax.f32 %v3216_v5, 0.0  ;;  %v3217_v38 = vadd.f32 %v4345_v39, %v5866_v58 }
 0x225   : > { %v3246_v28 = vmax.f32 %v3214_v12, 0.0  ;;  %v3215_v20 = vadd.f32 %v4346_v29, %v5866_v58 }
 0x226   : > { %v3312_v63 = vadd.f32 %v3280_v24, %v3248_v50  ;;  %v3249_v54 = vmax.f32 %v3217_v38, 0.0 }
 0x227   : > { %v3310_v19 = vadd.f32 %v3278_v62, %v3246_v28  ;;  %v3247_v57 = vmax.f32 %v3215_v20, 0.0  ;;  %v4149_v44 = vpop.f32.mrb[28].mxu1  ;;  %v4309_v18 = vpop.f32.mrb[28].mxu0 }
 0x228   : > { %3345 = vst.msk [vmem:[%s5883_s22 + $0xd0] sm:$0xff] %vm3318_vm7, %v3312_v63  ;;  %v3313_v4 = vadd.f32 %v3281_v13, %v3249_v54  ;;  %v4347_v32 = vadd.f32 %v4309_v18, %v4149_v44  ;;  %v2166_v27 = vpop.f32.mrb[29].mxu1  ;;  %v3136_v47 = vpop.f32.mrb[29].mxu0 }
 0x229   : > { %3343 = vst.msk [vmem:[%s5883_s22 + $0xc0] sm:$0xff] %vm3318_vm7, %v3310_v19  ;;  %v3311_v8 = vadd.f32 %v3279_v25, %v3247_v57  ;;  %v4348_v31 = vadd.f32 %v3136_v47, %v2166_v27  ;;  %v4150_v14 = vpop.f32.mrb[30].mxu1  ;;  %v4310_v9 = vpop.f32.mrb[30].mxu0 }
 0x22a   : > { %3346 = vst.msk [vmem:[%s5883_s22 + $0xd8] sm:$0xff] %vm3318_vm7, %v3313_v4  ;;  %v3220_v42 = vadd.f32 %v4347_v32, %v5866_v58  ;;  %v4349_v46 = vadd.f32 %v4310_v9, %v4150_v14  ;;  %v2169_v21 = vpop.f32.mrb[31].mxu1  ;;  %v3139_v35 = vpop.f32.mrb[31].mxu0 }
 0x22b   : > { %3344 = vst.msk [vmem:[%s5883_s22 + $0xc8] sm:$0xff] %vm3318_vm7, %v3311_v8  ;;  %v3218_v52 = vadd.f32 %v4348_v31, %v5866_v58  ;;  %v4350_v45 = vadd.f32 %v3139_v35, %v2169_v21 }
 0x22c   : > { %v3252_v10 = vmax.f32 %v3220_v42, 0.0  ;;  %v3221_v1 = vadd.f32 %v4349_v46, %v5866_v58 }
 0x22d   : > { %v3250_v41 = vmax.f32 %v3218_v52, 0.0  ;;  %v3219_v17 = vadd.f32 %v4350_v45, %v5866_v58 }
 0x22e   : > { %v3316_v56 = vadd.f32 %v3284_v3, %v3252_v10  ;;  %v3253_v30 = vmax.f32 %v3221_v1, 0.0 }
 0x22f   : > { %v3314_v23 = vadd.f32 %v3282_v16, %v3250_v41  ;;  %v3251_v37 = vmax.f32 %v3219_v17, 0.0 }
 0x230   : > { %3349 = vst.msk [vmem:[%s5883_s22 + $0xf0] sm:$0xff] %vm3318_vm7, %v3316_v56  ;;  %v3317_v7 = vadd.f32 %v3285_v40, %v3253_v30 }
 0x231   : > { %3347 = vst.msk [vmem:[%s5883_s22 + $0xe0] sm:$0xff] %vm3318_vm7, %v3314_v23  ;;  %v3315_v58 = vadd.f32 %v3283_v26, %v3251_v37 }
 0x232   : > { %3350 = vst.msk [vmem:[%s5883_s22 + $0xf8] sm:$0xff] %vm3318_vm7, %v3317_v7 }
 0x233   : > { %3348 = vst.msk [vmem:[%s5883_s22 + $0xe8] sm:$0xff] %vm3318_vm7, %v3315_v58 }
 0x234   : > { %4691 = shalt.err (!%p4688_p3)
}
 0x235   : > { %s4692_s10 = scalar_lea.hbm %s6012_s5, 4096  ;;  %s4696_s13 = scalar_lea.hbm %s6069_s4, 8192 }
 0x236   : > { %p4693_p4 = scmp.ne.s32.totalorder %s6012_s5, %s4692_s10  ;;  %p4697_p9 = scmp.lt.u32.totalorder %s6012_s5, %s6069_s4 }
 0x237   : > { %p4698_p10 = scmp.lt.u32.totalorder %s4696_s13, %s4692_s10  ;;  %p4700_p12 = scmp.lt.u32.totalorder %s4692_s10, %s6012_s5 }
 0x238   : > { %p4694_p7 = pnand %p4693_p4, %p4808_p5 }
 0x239   : > { %p4699_p11 = por %p4698_p10, %p4697_p9 }
 0x23a   : > { %p4695_p8 = pneg %p4694_p7 }
 0x23b   : > { %p4701_p13 = por %p4700_p12, %p4699_p11 }
 0x23d   : > { %p4702_p0 = pnand %p4701_p13, %p4695_p8 }
 0x23f   : > { %4705 = shalt.err (!%p4702_p0)
}
 0x240   : > { %s4743_s7 = smov 128   ;;  %s4744_s22 = smov 8  }
 0x241   : > { %4576 = dma.vmem_to_hbm [thread:$0]  (%p4808_p5), %s6014_s27, 4096, %s6012_s5, %s6024_s19, %s4743_s7, %s4743_s7, %s4744_s22  }
 0x242 PF: > { %p4582_p1 = scmp.ge.s32.totalorder %s4740_s18, 2  ;;  %s3380_s23 = sand.u32 1, %s4728_s15  }
 0x243   : > { %s3381_s29 = scalar_lea.sflag [#allocation3], %s3380_s23 }
 0x244   : > { %p4579_p2 = pnand %p4582_p1, %p4812_p6 }
 0x246   : > { %4723 = dma.done.wait (!%p4579_p2), %s3381_s29, 4096  }
 0x247   : > { %4725 = vsyncadd (!%p4579_p2), %s3381_s29, 4294963200  ;;  %p14_p3 = scmp.ge.s32.totalorder %s4795_s21, 4   ;;  %s6146_s15 = smov %s4732_s16 }
 0x248   : > { %s6147_s16 = smov %s4736_s17  ;;  %s6148_s17 = smov %s4806_s24 }
 0x249   : > { %s6149_s18 = smov %s4795_s21  ;;  %16 = sbr.rel (!%p14_p3) target bundleno = 3 (0x3), region = 82 }
 0x250   :  { %3386 = vsyncpa [#allocation3], 1 }
 0x251   :  { %3388 = vsyncpa [#allocation3 + $0x1], 1 }

</bundles_post_ra>
